<compile_context>
chip_gen: v6e
topology: v6e:2x2x1
jax: 0.10.0
libtpu: 0.0.40
codegen_flags: <defaults>
</compile_context>

<pallas_src>
import functools
import math

import jax
import jax.numpy as jnp
from jax.experimental import pallas as pl
from jax.experimental.pallas import tpu as pltpu


# ----------------------------- hardware-aware config -----------------------------

@functools.lru_cache(maxsize=None)
def _vmem_capacity_bytes():
    try:
        return int(pltpu.get_tpu_info().vmem_capacity_bytes)
    except Exception:
        # Conservative fallback (behaves like the known-good 128 MiB config).
        return 128 * 1024 * 1024


@functools.lru_cache(maxsize=None)
def _vmem_limit_bytes():
    # ~25% headroom for double-buffers / semaphores / internal scratch;
    # never request more than 64 MiB (v5e/v6e keep 64, v7x gets ~48).
    return int(min(64 * 1024 * 1024, (_vmem_capacity_bytes() * 3) // 4))


@functools.lru_cache(maxsize=None)
def _big_vmem():
    return _vmem_capacity_bytes() >= 100 * 1024 * 1024


# ----------------------------- tiling helpers -----------------------------

def _choose_tile(dim, target, align, prefer_split=False):
    """Largest aligned tile <= target that divides dim (full dim fallback).

    With prefer_split=True, avoid collapsing to a single block when the dim can
    be split into >=2 aligned blocks (keeps both v7x TensorCores busy)."""
    def best(limit):
        if dim <= limit:
            return dim
        t = (limit // align) * align
        while t >= align:
            if dim % t == 0:
                return t
            t -= align
        return dim

    t = best(target)
    if prefer_split and t == dim and dim >= 2 * align:
        t2 = best(dim // 2)
        if align <= t2 < dim:
            t = t2
    return t


def _choose_div(dim, target):
    """Largest divisor of dim that is <= target."""
    t = max(1, min(dim, target))
    while dim % t:
        t -= 1
    return t


# ----------------------------- tiled linear kernel -----------------------------

def _linear_kernel(x_ref, w_ref, b_ref, o_ref, acc_ref, *, act, n_k):
    k = pl.program_id(2)

    @pl.when(k == 0)
    def _():
        acc_ref[...] = jnp.zeros_like(acc_ref)

    acc_ref[...] += jnp.dot(
        x_ref[...], w_ref[...], preferred_element_type=jnp.float32
    )

    @pl.when(k == n_k - 1)
    def _():
        acc = acc_ref[...] + b_ref[...].astype(jnp.float32)
        if act == "gelu":
            acc = jax.nn.gelu(acc)
        elif act == "tanh":
            acc = jnp.tanh(acc)
        elif act == "sigmoid":
            acc = jax.nn.sigmoid(acc)
        o_ref[...] = acc.astype(o_ref.dtype)


def linear(x, w, b, act="none", out_dtype=jnp.bfloat16,
           tm_target=None, tn_target=None, tk_target=None):
    """out = act(x @ w + b); x: (M, K) bf16, w: (K, N) bf16, b: (N,) f32."""
    M, K = x.shape
    Kw, N = w.shape
    assert K == Kw
    if tm_target is None:
        tm_target = 512 if _big_vmem() else 256
    if tn_target is None:
        tn_target = 1024 if _big_vmem() else 512
    if tk_target is None:
        tk_target = 1024 if _big_vmem() else 512
    tm = _choose_tile(M, tm_target, 8, prefer_split=True)
    tk = _choose_tile(K, tk_target, 128)
    tn = _choose_tile(N, tn_target, 128)
    grid = (M // tm, N // tn, K // tk)

    return pl.pallas_call(
        functools.partial(_linear_kernel, act=act, n_k=grid[2]),
        out_shape=jax.ShapeDtypeStruct((M, N), out_dtype),
        grid_spec=pltpu.PrefetchScalarGridSpec(
            num_scalar_prefetch=0,
            grid=grid,
            in_specs=[
                pl.BlockSpec((tm, tk), lambda i, j, k: (i, k)),
                pl.BlockSpec((tk, tn), lambda i, j, k: (k, j)),
                pl.BlockSpec((1, tn), lambda i, j, k: (0, j)),
            ],
            out_specs=pl.BlockSpec((tm, tn), lambda i, j, k: (i, j)),
            scratch_shapes=[pltpu.VMEM((tm, tn), jnp.float32)],
        ),
        compiler_params=pltpu.CompilerParams(
            dimension_semantics=("parallel", "parallel", "arbitrary"),
            vmem_limit_bytes=_vmem_limit_bytes(),
        ),
    )(x, w, b.reshape(1, N))


# ----------------------------- layernorm kernels -----------------------------

def _ln_math(x, g, b):
    mu = jnp.mean(x, axis=-1, keepdims=True)
    var = jnp.mean(jnp.square(x - mu), axis=-1, keepdims=True)
    return (x - mu) * jax.lax.rsqrt(var + 1e-12) * g + b


def _layernorm_kernel(x_ref, g_ref, b_ref, o_ref):
    x = x_ref[...].astype(jnp.float32)
    o_ref[...] = _ln_math(x, g_ref[...], b_ref[...]).astype(o_ref.dtype)


def _add_layernorm_kernel(x_ref, r_ref, g_ref, b_ref, o_ref):
    x = x_ref[...].astype(jnp.float32) + r_ref[...].astype(jnp.float32)
    o_ref[...] = _ln_math(x, g_ref[...], b_ref[...]).astype(o_ref.dtype)


def layernorm(x, g, b, residual=None, out_dtype=jnp.bfloat16):
    """Row-tiled layernorm over (T, H); optionally fuses a residual add."""
    T, H = x.shape
    tm = _choose_tile(T, 512, 8, prefer_split=True)
    grid = (T // tm,)
    row_spec = pl.BlockSpec((tm, H), lambda i: (i, 0))
    gb_spec = pl.BlockSpec((1, H), lambda i: (0, 0))
    g2 = g.reshape(1, H)
    b2 = b.reshape(1, H)

    if residual is None:
        kernel, in_specs, args = _layernorm_kernel, [row_spec, gb_spec, gb_spec], (x, g2, b2)
    else:
        kernel, in_specs, args = (_add_layernorm_kernel,
                                  [row_spec, row_spec, gb_spec, gb_spec],
                                  (x, residual, g2, b2))

    return pl.pallas_call(
        kernel,
        out_shape=jax.ShapeDtypeStruct((T, H), out_dtype),
        grid=grid,
        in_specs=in_specs,
        out_specs=row_spec,
        compiler_params=pltpu.CompilerParams(dimension_semantics=("parallel",)),
    )(*args)


# embedding layernorm: fuses (word + pos + type) add into the LN kernel
def _emb_ln_kernel(x_ref, pt_ref, g_ref, b_ref, o_ref):
    x = x_ref[...].astype(jnp.float32) + pt_ref[...].astype(jnp.float32)[None, :, :]
    o_ref[...] = _ln_math(x, g_ref[...], b_ref[...]).astype(o_ref.dtype)


def embed_layernorm(word, pos_type, g, b, out_dtype=jnp.bfloat16):
    """word: (BB, S, H) gathered token embeddings; pos_type: (S, H)."""
    BB, S, H = word.shape
    bblk = _choose_div(BB, min(8, max(1, BB // 2)))
    grid = (BB // bblk,)
    return pl.pallas_call(
        _emb_ln_kernel,
        out_shape=jax.ShapeDtypeStruct((BB, S, H), out_dtype),
        grid=grid,
        in_specs=[
            pl.BlockSpec((bblk, S, H), lambda i: (i, 0, 0)),
            pl.BlockSpec((S, H), lambda i: (0, 0)),
            pl.BlockSpec((1, H), lambda i: (0, 0)),
            pl.BlockSpec((1, H), lambda i: (0, 0)),
        ],
        out_specs=pl.BlockSpec((bblk, S, H), lambda i: (i, 0, 0)),
        compiler_params=pltpu.CompilerParams(dimension_semantics=("parallel",)),
    )(word, pos_type, g.reshape(1, H), b.reshape(1, H))


# --------------- attention: per-head-group grid, bf16 MXU operands, Wo fused ---------------

def _attn_wo_kernel(q_ref, k_ref, v_ref, wo_ref, bo_ref, o_ref, acc_ref,
                    *, hpg, dh, scale, n_groups):
    g = pl.program_id(1)

    @pl.when(g == 0)
    def _():
        acc_ref[...] = jnp.zeros_like(acc_ref)

    # small static unroll over the heads inside this 128-lane-wide group
    for h in range(hpg):
        sl = slice(h * dh, (h + 1) * dh)
        qh = q_ref[:, :, sl]                      # bf16 (bt, S, dh)
        kh = k_ref[:, :, sl]
        vh = v_ref[:, :, sl]
        s = jnp.einsum("bqd,bkd->bqk", qh, kh,
                       preferred_element_type=jnp.float32) * scale
        s = s - jnp.max(s, axis=-1, keepdims=True)
        p = jnp.exp(s)
        p = p * pl.reciprocal(jnp.sum(p, axis=-1, keepdims=True), approx=True)
        ctx = jnp.einsum("bqk,bkd->bqd", p.astype(jnp.bfloat16), vh,
                         preferred_element_type=jnp.float32)
        # fused output projection: accumulate ctx_h @ Wo[rows of head h]
        acc_ref[...] += jnp.einsum("bsd,dn->bsn", ctx.astype(jnp.bfloat16),
                                   wo_ref[sl, :],
                                   preferred_element_type=jnp.float32)

    @pl.when(g == n_groups - 1)
    def _():
        o_ref[...] = (acc_ref[...] + bo_ref[...].astype(jnp.float32)).astype(o_ref.dtype)


def attention_wo(qkv, wo, bo, n_heads):
    """Self-attention with fused output projection.

    qkv: (BB, S, 3H) bf16 (fused Q|K|V), wo: (H, H) bf16, bo: (H,) f32.
    Returns Wo @ softmax(QK^T/sqrt(dh)) V + bo  as (BB, S, H) bf16."""
    BB, S, H3 = qkv.shape
    H = H3 // 3
    dh = H // n_heads
    assert H % 128 == 0, "hidden size must be a multiple of 128 for lane-blocked attention"

    # smallest number of heads per group whose lane width is a multiple of 128
    hpg = n_heads
    for c in range(1, n_heads + 1):
        if n_heads % c == 0 and (c * dh) % 128 == 0:
            hpg = c
            break
    gw = hpg * dh
    n_groups = n_heads // hpg
    scale = 1.0 / math.sqrt(dh)

    bt = _choose_div(BB, min(8, max(1, BB // 2)))   # >=2 batch blocks when possible
    grid = (BB // bt, n_groups)

    return pl.pallas_call(
        functools.partial(_attn_wo_kernel, hpg=hpg, dh=dh, scale=scale,
                          n_groups=n_groups),
        out_shape=jax.ShapeDtypeStruct((BB, S, H), jnp.bfloat16),
        grid_spec=pltpu.PrefetchScalarGridSpec(
            num_scalar_prefetch=0,
            grid=grid,
            in_specs=[
                # lane-blocked windows of the same fused qkv tensor
                pl.BlockSpec((bt, S, gw), lambda i, g: (i, 0, g)),
                pl.BlockSpec((bt, S, gw), lambda i, g: (i, 0, n_groups + g)),
                pl.BlockSpec((bt, S, gw), lambda i, g: (i, 0, 2 * n_groups + g)),
                pl.BlockSpec((gw, H), lambda i, g: (g, 0)),
                pl.BlockSpec((1, H), lambda i, g: (0, 0)),
            ],
            out_specs=pl.BlockSpec((bt, S, H), lambda i, g: (i, 0, 0)),
            scratch_shapes=[pltpu.VMEM((bt, S, H), jnp.float32)],
        ),
        compiler_params=pltpu.CompilerParams(
            dimension_semantics=("parallel", "arbitrary"),
            vmem_limit_bytes=_vmem_limit_bytes(),
        ),
    )(qkv, qkv, qkv, wo, bo.reshape(1, H))


# ----------------------------- fused head: linear (+sigmoid on concept half) + dot-sum ---------------

def _head_kernel(pooled_ref, w_ref, b_ref, users_ref, o_ref, *, b_split):
    e = jnp.dot(pooled_ref[...], w_ref[...], preferred_element_type=jnp.float32)
    e = e + b_ref[...].astype(jnp.float32)
    row = jax.lax.broadcasted_iota(jnp.int32, e.shape, 0)
    e = jnp.where(row >= b_split, jax.nn.sigmoid(e), e)     # sigmoid only on concept half
    u = users_ref[...].astype(jnp.float32)
    o_ref[...] = jnp.sum(u * e, axis=-1, keepdims=True)


def fused_head(pooled, w, b, users, *, b_split):
    """sum(users * act(pooled @ w + b), -1) for both halves in one launch."""
    BB, _ = pooled.shape
    E = w.shape[1]
    # lane-dense E: pad to a multiple of 128 (padded cols contribute 0 because
    # the corresponding user-embedding cols are zero-padded).
    E_pad = ((E + 127) // 128) * 128
    if E_pad != E:
        w = jnp.pad(w, ((0, 0), (0, E_pad - E)))
        b = jnp.pad(b, (0, E_pad - E))
        users = jnp.pad(users, ((0, 0), (0, E_pad - E)))

    vmem = pl.BlockSpec(memory_space=pltpu.MemorySpace.VMEM)
    out = pl.pallas_call(
        functools.partial(_head_kernel, b_split=b_split),
        out_shape=jax.ShapeDtypeStruct((BB, 1), jnp.float32),
        in_specs=[vmem, vmem, vmem, vmem],
        out_specs=vmem,
    )(pooled, w, b.reshape(1, E_pad), users)
    return out[:, 0]


# ----------------------------- mini BERT encoder -----------------------------

def bert_encode(bert, input_ids, n_heads):
    BB, S = input_ids.shape
    H = bert["word_emb"].shape[-1]

    # token gather stays as an XLA gather; the (word + pos + type) add is fused
    # into the embedding layernorm kernel (no extra (T,H) HBM round trip).
    word = bert["word_emb"][input_ids]                        # (BB, S, H) bf16
    pos_type = bert["pos_emb"][:S] + bert["type_emb"][0]      # (S, H) bf16, tiny
    x = embed_layernorm(word, pos_type, bert["emb_ln_g"], bert["emb_ln_b"])
    x = x.reshape(BB * S, H)

    for layer in bert["layers"]:
        # fused Q|K|V projection: one (H, 3H) matmul
        qkv = linear(x, layer["wqkv"], layer["bqkv"])                    # (T, 3H)
        # attention with fused output projection (Wo, bo) -> (T, H), no ctx HBM trip
        attn_out = attention_wo(qkv.reshape(BB, S, 3 * H), layer["wo"],
                                layer["bo"], n_heads).reshape(BB * S, H)
        x = layernorm(attn_out, layer["ln1_g"], layer["ln1_b"], residual=x)

        h = linear(x, layer["wi"], layer["bi"], act="gelu")
        ff = linear(h, layer["wf"], layer["bf"])
        x = layernorm(ff, layer["ln2_g"], layer["ln2_b"], residual=x)

    seq_out = x.reshape(BB, S, H)                                        # doc_bert_embs[0]
    cls = seq_out[:, 0, :]
    pooled = linear(cls, bert["pool_w"], bert["pool_b"], act="tanh")     # (BB, H)
    return seq_out, pooled


# ----------------------------- CAUEBert forward -----------------------------

def caue_bert_forward(params, input_doc_ids, input_uids4doc,
                      input_uids4concept, input_concept_ids, *, n_heads):
    B = input_doc_ids.shape[0]

    # user embeddings for both branches, concatenated -> one fused head kernel
    users = jnp.concatenate(
        [params["uemb"][input_uids4doc], params["uemb"][input_uids4concept]], axis=0
    )                                                                   # (2B, E)

    # batch doc + concept tokens -> a single BERT pass
    ids = jnp.concatenate([input_doc_ids, input_concept_ids], axis=0)   # (2B, S)
    _, pooled = bert_encode(params["bert"], ids, n_heads)               # (2B, H)

    # fused: linear(+sigmoid on concept half) + per-user dot product
    # nn.Dropout in eval mode is identity.
    sims = fused_head(pooled, params["lin_w"], params["lin_b"], users, b_split=B)
    return sims[:B], sims[B:]


# ----------------------------- parameter init -----------------------------

def init_params(key, *, user_size, emb_dim, vocab, hidden, n_layers,
                n_heads, intermediate, max_pos):
    keys = iter(jax.random.split(key, 256))

    def dense(shape, scale=0.02, dtype=jnp.bfloat16):
        return (scale * jax.random.normal(next(keys), shape)).astype(dtype)

    # nn.Embedding + kaiming_uniform_(a=sqrt(5)) -> U(-1/sqrt(fan_in), 1/sqrt(fan_in))
    bound = 1.0 / math.sqrt(emb_dim)
    uemb = jax.random.uniform(next(keys), (user_size, emb_dim),
                              minval=-bound, maxval=bound, dtype=jnp.float32)

    layers = []
    for _ in range(n_layers):
        layers.append(dict(
            wqkv=dense((hidden, 3 * hidden)),                  # fused Wq|Wk|Wv
            bqkv=jnp.zeros((3 * hidden,), jnp.float32),
            wo=dense((hidden, hidden)), bo=jnp.zeros((hidden,), jnp.float32),
            ln1_g=jnp.ones((hidden,), jnp.float32),
            ln1_b=jnp.zeros((hidden,), jnp.float32),
            wi=dense((hidden, intermediate)),
            bi=jnp.zeros((intermediate,), jnp.float32),
            wf=dense((intermediate, hidden)),
            bf=jnp.zeros((hidden,), jnp.float32),
            ln2_g=jnp.ones((hidden,), jnp.float32),
            ln2_b=jnp.zeros((hidden,), jnp.float32),
        ))

    bert = dict(
        word_emb=dense((vocab, hidden)),
        pos_emb=dense((max_pos, hidden)),
        type_emb=dense((2, hidden)),
        emb_ln_g=jnp.ones((hidden,), jnp.float32),
        emb_ln_b=jnp.zeros((hidden,), jnp.float32),
        layers=layers,
        pool_w=dense((hidden, hidden)),
        pool_b=jnp.zeros((hidden,), jnp.float32),
    )

    return dict(
        uemb=uemb,
        bert=bert,
        lin_w=dense((hidden, emb_dim)),
        lin_b=jnp.zeros((emb_dim,), jnp.float32),
    )


# ----------------------------- main -----------------------------

if __name__ == "__main__":
    B, S = 2, 8
    cfg = dict(user_size=16, emb_dim=32, vocab=64, hidden=128,
               n_layers=2, n_heads=2, intermediate=256, max_pos=16)

    params = init_params(jax.random.PRNGKey(0), **cfg)

    kd, kc, ku1, ku2 = jax.random.split(jax.random.PRNGKey(1), 4)
    input_doc_ids = jax.random.randint(kd, (B, S), 0, cfg["vocab"], dtype=jnp.int32)
    input_concept_ids = jax.random.randint(kc, (B, S), 0, cfg["vocab"], dtype=jnp.int32)
    input_uids4doc = jax.random.randint(ku1, (B,), 0, cfg["user_size"], dtype=jnp.int32)
    input_uids4concept = jax.random.randint(ku2, (B,), 0, cfg["user_size"], dtype=jnp.int32)

    fwd = jax.jit(functools.partial(caue_bert_forward, n_heads=cfg["n_heads"]))
    user_doc_sims, user_concept_sims = fwd(
        params, input_doc_ids, input_uids4doc, input_uids4concept, input_concept_ids
    )
    jax.block_until_ready((user_doc_sims, user_concept_sims))

    assert user_doc_sims.shape == (B,) and user_concept_sims.shape == (B,)
    assert jnp.all(jnp.isfinite(user_doc_sims)) and jnp.all(jnp.isfinite(user_concept_sims))
    print("KERNEL_OK")
</pallas_src>

<mosaic_0001>
module attributes {stable_mosaic.version = 11 : i64} {
  func.func @_emb_ln_kernel(%arg0: i32, %arg1: memref<2x8x128xbf16, #tpu.memory_space<vmem>>, %arg2: memref<8x128xbf16, #tpu.memory_space<vmem>>, %arg3: memref<1x128xf32, #tpu.memory_space<vmem>>, %arg4: memref<1x128xf32, #tpu.memory_space<vmem>>, %arg5: memref<2x8x128xbf16, #tpu.memory_space<vmem>>) attributes {dimension_semantics = [#tpu.dimension_semantics<parallel>], iteration_bounds = array<i64: 2>, scalar_prefetch = 0 : i64, scratch_operands = 0 : i64, tpu.core_type = #tpu.core_type<tc>, window_params = [{transform_indices = @transform_0, window_bounds = array<i64: 2, 8, 128>}, {pipeline_mode = #tpu.pipeline_mode<synchronous>, transform_indices = @transform_1, window_bounds = array<i64: 8, 128>}, {pipeline_mode = #tpu.pipeline_mode<synchronous>, transform_indices = @transform_2, window_bounds = array<i64: 1, 128>}, {pipeline_mode = #tpu.pipeline_mode<synchronous>, transform_indices = @transform_3, window_bounds = array<i64: 1, 128>}, {transform_indices = @transform_4, window_bounds = array<i64: 2, 8, 128>}]} {
    %c0 = arith.constant 0 : index
    %c0_0 = arith.constant 0 : index
    %c0_1 = arith.constant 0 : index
    %0 = vector.load %arg1[%c0, %c0_0, %c0_1] : memref<2x8x128xbf16, #tpu.memory_space<vmem>>, vector<2x8x128xbf16>
    %1 = arith.extf %0 : vector<2x8x128xbf16> to vector<2x8x128xf32>
    %c0_2 = arith.constant 0 : index
    %c0_3 = arith.constant 0 : index
    %2 = vector.load %arg2[%c0_2, %c0_3] : memref<8x128xbf16, #tpu.memory_space<vmem>>, vector<8x128xbf16>
    %3 = arith.extf %2 : vector<8x128xbf16> to vector<8x128xf32>
    %4 = vector.shape_cast %3 : vector<8x128xf32> to vector<1x8x128xf32>
    %5 = vector.broadcast %4 : vector<1x8x128xf32> to vector<2x8x128xf32>
    %6 = arith.addf %1, %5 : vector<2x8x128xf32>
    %c0_4 = arith.constant 0 : index
    %c0_5 = arith.constant 0 : index
    %7 = vector.load %arg3[%c0_4, %c0_5] : memref<1x128xf32, #tpu.memory_space<vmem>>, vector<1x128xf32>
    %c0_6 = arith.constant 0 : index
    %c0_7 = arith.constant 0 : index
    %8 = vector.load %arg4[%c0_6, %c0_7] : memref<1x128xf32, #tpu.memory_space<vmem>>, vector<1x128xf32>
    %cst = arith.constant dense<0.000000e+00> : vector<2x8xf32>
    %9 = vector.multi_reduction <add>, %6, %cst [2] : vector<2x8x128xf32> to vector<2x8xf32>
    %10 = vector.shape_cast %9 : vector<2x8xf32> to vector<2x8x1xf32>
    %cst_8 = arith.constant 1.280000e+02 : f32
    %11 = vector.broadcast %cst_8 : f32 to vector<2x8x1xf32>
    %12 = arith.divf %10, %11 : vector<2x8x1xf32>
    %13 = vector.broadcast %12 : vector<2x8x1xf32> to vector<2x8x128xf32>
    %14 = arith.subf %6, %13 : vector<2x8x128xf32>
    %15 = arith.mulf %14, %14 : vector<2x8x128xf32>
    %cst_9 = arith.constant dense<0.000000e+00> : vector<2x8xf32>
    %16 = vector.multi_reduction <add>, %15, %cst_9 [2] : vector<2x8x128xf32> to vector<2x8xf32>
    %17 = vector.shape_cast %16 : vector<2x8xf32> to vector<2x8x1xf32>
    %cst_10 = arith.constant 1.280000e+02 : f32
    %18 = vector.broadcast %cst_10 : f32 to vector<2x8x1xf32>
    %19 = arith.divf %17, %18 : vector<2x8x1xf32>
    %20 = vector.broadcast %12 : vector<2x8x1xf32> to vector<2x8x128xf32>
    %21 = arith.subf %6, %20 : vector<2x8x128xf32>
    %cst_11 = arith.constant 9.99999996E-13 : f32
    %22 = vector.broadcast %cst_11 : f32 to vector<2x8x1xf32>
    %23 = arith.addf %19, %22 : vector<2x8x1xf32>
    %24 = math.rsqrt %23 : vector<2x8x1xf32>
    %25 = vector.broadcast %24 : vector<2x8x1xf32> to vector<2x8x128xf32>
    %26 = arith.mulf %21, %25 : vector<2x8x128xf32>
    %27 = vector.shape_cast %7 : vector<1x128xf32> to vector<1x1x128xf32>
    %28 = vector.broadcast %27 : vector<1x1x128xf32> to vector<2x8x128xf32>
    %29 = arith.mulf %26, %28 : vector<2x8x128xf32>
    %30 = vector.shape_cast %8 : vector<1x128xf32> to vector<1x1x128xf32>
    %31 = vector.broadcast %30 : vector<1x1x128xf32> to vector<2x8x128xf32>
    %32 = arith.addf %29, %31 : vector<2x8x128xf32>
    %33 = arith.truncf %32 : vector<2x8x128xf32> to vector<2x8x128xbf16>
    %c0_12 = arith.constant 0 : index
    %c0_13 = arith.constant 0 : index
    %c0_14 = arith.constant 0 : index
    %34 = vector.load %arg5[%c0_12, %c0_13, %c0_14] : memref<2x8x128xbf16, #tpu.memory_space<vmem>>, vector<2x8x128xbf16>
    tpu.vector_store %arg5[%c0_12, %c0_13, %c0_14], %33 {strides = array<i32>} : memref<2x8x128xbf16, #tpu.memory_space<vmem>>, vector<2x8x128xbf16>,
    return
  }
  func.func @transform_0(%arg0: i32) -> (i32, i32, i32) {
    %c0_i32 = arith.constant 0 : i32
    %c0_i32_0 = arith.constant 0 : i32
    %c0_i32_1 = arith.constant 0 : i32
    return %arg0, %c0_i32, %c0_i32_0 : i32, i32, i32
  }
  func.func @transform_1(%arg0: i32) -> (i32, i32) {
    %c0_i32 = arith.constant 0 : i32
    %c0_i32_0 = arith.constant 0 : i32
    %c0_i32_1 = arith.constant 0 : i32
    return %c0_i32, %c0_i32_0 : i32, i32
  }
  func.func @transform_2(%arg0: i32) -> (i32, i32) {
    %c0_i32 = arith.constant 0 : i32
    %c0_i32_0 = arith.constant 0 : i32
    %c0_i32_1 = arith.constant 0 : i32
    return %c0_i32, %c0_i32_0 : i32, i32
  }
  func.func @transform_3(%arg0: i32) -> (i32, i32) {
    %c0_i32 = arith.constant 0 : i32
    %c0_i32_0 = arith.constant 0 : i32
    %c0_i32_1 = arith.constant 0 : i32
    return %c0_i32, %c0_i32_0 : i32, i32
  }
  func.func @transform_4(%arg0: i32) -> (i32, i32, i32) {
    %c0_i32 = arith.constant 0 : i32
    %c0_i32_0 = arith.constant 0 : i32
    %c0_i32_1 = arith.constant 0 : i32
    return %arg0, %c0_i32, %c0_i32_0 : i32, i32, i32
  }
}

module attributes {stable_mosaic.version = 11 : i64} {
  func.func @_linear_kernel(%arg0: i32, %arg1: i32, %arg2: i32, %arg3: memref<16x128xbf16, #tpu.memory_space<vmem>>, %arg4: memref<128x384xbf16, #tpu.memory_space<vmem>>, %arg5: memref<1x384xf32, #tpu.memory_space<vmem>>, %arg6: memref<16x384xbf16, #tpu.memory_space<vmem>>, %arg7: memref<16x384xf32, #tpu.memory_space<vmem>>) attributes {dimension_semantics = [#tpu.dimension_semantics<parallel>, #tpu.dimension_semantics<parallel>, #tpu.dimension_semantics<arbitrary>], iteration_bounds = array<i64: 2, 1, 1>, scalar_prefetch = 0 : i64, scratch_operands = 1 : i64, tpu.core_type = #tpu.core_type<tc>, window_params = [{transform_indices = @transform_0, window_bounds = array<i64: 16, 128>}, {transform_indices = @transform_1, window_bounds = array<i64: 128, 384>}, {transform_indices = @transform_2, window_bounds = array<i64: 1, 384>}, {transform_indices = @transform_3, window_bounds = array<i64: 16, 384>}]} {
    %c0_i32 = arith.constant 0 : i32
    %0 = arith.cmpi eq, %arg2, %c0_i32 : i32
    %1 = arith.extui %0 : i1 to i32
    %c0_i32_0 = arith.constant 0 : i32
    %2 = arith.cmpi ne, %1, %c0_i32_0 : i32
    scf.if %2 {
      %cst_10 = arith.constant 0.000000e+00 : f32
      %12 = vector.broadcast %cst_10 : f32 to vector<16x384xf32>
      %c0_11 = arith.constant 0 : index
      %c0_12 = arith.constant 0 : index
      %13 = vector.load %arg7[%c0_11, %c0_12] : memref<16x384xf32, #tpu.memory_space<vmem>>, vector<16x384xf32>
      tpu.vector_store %arg7[%c0_11, %c0_12], %12 {strides = array<i32>} : memref<16x384xf32, #tpu.memory_space<vmem>>, vector<16x384xf32>,
    } else {
    }
    %c0 = arith.constant 0 : index
    %c0_1 = arith.constant 0 : index
    %3 = vector.load %arg7[%c0, %c0_1] : memref<16x384xf32, #tpu.memory_space<vmem>>, vector<16x384xf32>
    %c0_2 = arith.constant 0 : index
    %c0_3 = arith.constant 0 : index
    %4 = vector.load %arg3[%c0_2, %c0_3] : memref<16x128xbf16, #tpu.memory_space<vmem>>, vector<16x128xbf16>
    %c0_4 = arith.constant 0 : index
    %c0_5 = arith.constant 0 : index
    %5 = vector.load %arg4[%c0_4, %c0_5] : memref<128x384xbf16, #tpu.memory_space<vmem>>, vector<128x384xbf16>
    %cst = arith.constant dense<0.000000e+00> : vector<16x384xf32>
    %6 = tpu.matmul %4, %5, %cst {dimension_numbers = #tpu.dot_dimension_numbers<[1], [0], [0], [1], [0, 0, 1, 1], [], []>} : vector<16x128xbf16>, vector<128x384xbf16>, vector<16x384xf32> -> vector<16x384xf32>
    %7 = arith.addf %3, %6 : vector<16x384xf32>
    %c0_6 = arith.constant 0 : index
    %c0_7 = arith.constant 0 : index
    %8 = vector.load %arg7[%c0_6, %c0_7] : memref<16x384xf32, #tpu.memory_space<vmem>>, vector<16x384xf32>
    tpu.vector_store %arg7[%c0_6, %c0_7], %7 {strides = array<i32>} : memref<16x384xf32, #tpu.memory_space<vmem>>, vector<16x384xf32>,
    %c0_i32_8 = arith.constant 0 : i32
    %9 = arith.cmpi eq, %arg2, %c0_i32_8 : i32
    %10 = arith.extui %9 : i1 to i32
    %c0_i32_9 = arith.constant 0 : i32
    %11 = arith.cmpi ne, %10, %c0_i32_9 : i32
    scf.if %11 {
      %c0_10 = arith.constant 0 : index
      %c0_11 = arith.constant 0 : index
      %12 = vector.load %arg7[%c0_10, %c0_11] : memref<16x384xf32, #tpu.memory_space<vmem>>, vector<16x384xf32>
      %c0_12 = arith.constant 0 : index
      %c0_13 = arith.constant 0 : index
      %13 = vector.load %arg5[%c0_12, %c0_13] : memref<1x384xf32, #tpu.memory_space<vmem>>, vector<1x384xf32>
      %14 = vector.broadcast %13 : vector<1x384xf32> to vector<16x384xf32>
      %15 = arith.addf %12, %14 : vector<16x384xf32>
      %16 = arith.truncf %15 : vector<16x384xf32> to vector<16x384xbf16>
      %c0_14 = arith.constant 0 : index
      %c0_15 = arith.constant 0 : index
      %17 = vector.load %arg6[%c0_14, %c0_15] : memref<16x384xbf16, #tpu.memory_space<vmem>>, vector<16x384xbf16>
      tpu.vector_store %arg6[%c0_14, %c0_15], %16 {strides = array<i32>} : memref<16x384xbf16, #tpu.memory_space<vmem>>, vector<16x384xbf16>,
    } else {
    }
    return
  }
  func.func @transform_0(%arg0: i32, %arg1: i32, %arg2: i32) -> (i32, i32) {
    %c0_i32 = arith.constant 0 : i32
    return %arg0, %arg2 : i32, i32
  }
  func.func @transform_1(%arg0: i32, %arg1: i32, %arg2: i32) -> (i32, i32) {
    %c0_i32 = arith.constant 0 : i32
    return %arg2, %arg1 : i32, i32
  }
  func.func @transform_2(%arg0: i32, %arg1: i32, %arg2: i32) -> (i32, i32) {
    %c0_i32 = arith.constant 0 : i32
    %c0_i32_0 = arith.constant 0 : i32
    return %c0_i32, %arg1 : i32, i32
  }
  func.func @transform_3(%arg0: i32, %arg1: i32, %arg2: i32) -> (i32, i32) {
    %c0_i32 = arith.constant 0 : i32
    return %arg0, %arg1 : i32, i32
  }
}

module attributes {stable_mosaic.version = 11 : i64} {
  func.func @_attn_wo_kernel(%arg0: i32, %arg1: i32, %arg2: memref<2x8x128xbf16, #tpu.memory_space<vmem>>, %arg3: memref<2x8x128xbf16, #tpu.memory_space<vmem>>, %arg4: memref<2x8x128xbf16, #tpu.memory_space<vmem>>, %arg5: memref<128x128xbf16, #tpu.memory_space<vmem>>, %arg6: memref<1x128xf32, #tpu.memory_space<vmem>>, %arg7: memref<2x8x128xbf16, #tpu.memory_space<vmem>>, %arg8: memref<2x8x128xf32, #tpu.memory_space<vmem>>) attributes {dimension_semantics = [#tpu.dimension_semantics<parallel>, #tpu.dimension_semantics<arbitrary>], iteration_bounds = array<i64: 2, 1>, scalar_prefetch = 0 : i64, scratch_operands = 1 : i64, tpu.core_type = #tpu.core_type<tc>, window_params = [{transform_indices = @transform_0, window_bounds = array<i64: 2, 8, 128>}, {transform_indices = @transform_1, window_bounds = array<i64: 2, 8, 128>}, {transform_indices = @transform_2, window_bounds = array<i64: 2, 8, 128>}, {transform_indices = @transform_3, window_bounds = array<i64: 128, 128>}, {pipeline_mode = #tpu.pipeline_mode<synchronous>, transform_indices = @transform_4, window_bounds = array<i64: 1, 128>}, {transform_indices = @transform_5, window_bounds = array<i64: 2, 8, 128>}]} {
    %c0_i32 = arith.constant 0 : i32
    %0 = arith.cmpi eq, %arg1, %c0_i32 : i32
    %1 = arith.extui %0 : i1 to i32
    %c0_i32_0 = arith.constant 0 : i32
    %2 = arith.cmpi ne, %1, %c0_i32_0 : i32
    scf.if %2 {
      %cst_46 = arith.constant 0.000000e+00 : f32
      %54 = vector.broadcast %cst_46 : f32 to vector<2x8x128xf32>
      %c0_47 = arith.constant 0 : index
      %c0_48 = arith.constant 0 : index
      %c0_49 = arith.constant 0 : index
      %55 = vector.load %arg8[%c0_47, %c0_48, %c0_49] : memref<2x8x128xf32, #tpu.memory_space<vmem>>, vector<2x8x128xf32>
      tpu.vector_store %arg8[%c0_47, %c0_48, %c0_49], %54 {strides = array<i32>} : memref<2x8x128xf32, #tpu.memory_space<vmem>>, vector<2x8x128xf32>,
    } else {
    }
    %c0 = arith.constant 0 : index
    %c0_1 = arith.constant 0 : index
    %c0_2 = arith.constant 0 : index
    %3 = vector.load %arg2[%c0, %c0_1, %c0_2] : memref<2x8x128xbf16, #tpu.memory_space<vmem>>, vector<2x8x64xbf16>
    %c0_3 = arith.constant 0 : index
    %c0_4 = arith.constant 0 : index
    %c0_5 = arith.constant 0 : index
    %4 = vector.load %arg3[%c0_3, %c0_4, %c0_5] : memref<2x8x128xbf16, #tpu.memory_space<vmem>>, vector<2x8x64xbf16>
    %c0_6 = arith.constant 0 : index
    %c0_7 = arith.constant 0 : index
    %c0_8 = arith.constant 0 : index
    %5 = vector.load %arg4[%c0_6, %c0_7, %c0_8] : memref<2x8x128xbf16, #tpu.memory_space<vmem>>, vector<2x8x64xbf16>
    "tpu.trace_start"() <{level = 10 : i32, message = "bqd,bkd->bqk"}> : () -> ()
    %cst = arith.constant dense<0.000000e+00> : vector<2x8x8xf32>
    %6 = tpu.matmul %3, %4, %cst {dimension_numbers = #tpu.dot_dimension_numbers<[2], [2], [1], [1], [0, 0, 0, 1, 1, 1], [0], [0]>} : vector<2x8x64xbf16>, vector<2x8x64xbf16>, vector<2x8x8xf32> -> vector<2x8x8xf32>
    "tpu.trace_stop"() : () -> ()
    %cst_9 = arith.constant 1.250000e-01 : f32
    %7 = vector.broadcast %cst_9 : f32 to vector<2x8x8xf32>
    %8 = arith.mulf %6, %7 : vector<2x8x8xf32>
    %cst_10 = arith.constant dense<0xFF800000> : vector<2x8xf32>
    %9 = vector.multi_reduction <maximumf>, %8, %cst_10 [2] : vector<2x8x8xf32> to vector<2x8xf32>
    %10 = vector.shape_cast %9 : vector<2x8xf32> to vector<2x8x1xf32>
    %11 = vector.broadcast %10 : vector<2x8x1xf32> to vector<2x8x8xf32>
    %12 = arith.subf %8, %11 : vector<2x8x8xf32>
    %13 = math.exp %12 : vector<2x8x8xf32>
    %cst_11 = arith.constant dense<0.000000e+00> : vector<2x8xf32>
    %14 = vector.multi_reduction <add>, %13, %cst_11 [2] : vector<2x8x8xf32> to vector<2x8xf32>
    %15 = vector.shape_cast %14 : vector<2x8xf32> to vector<2x8x1xf32>
    %16 = tpu.reciprocal %15 {approx = true} : vector<2x8x1xf32> -> vector<2x8x1xf32>
    %17 = vector.broadcast %16 : vector<2x8x1xf32> to vector<2x8x8xf32>
    %18 = arith.mulf %13, %17 : vector<2x8x8xf32>
    %19 = arith.truncf %18 : vector<2x8x8xf32> to vector<2x8x8xbf16>
    "tpu.trace_start"() <{level = 10 : i32, message = "bqk,bkd->bqd"}> : () -> ()
    %cst_12 = arith.constant dense<0.000000e+00> : vector<2x8x64xf32>
    %20 = tpu.matmul %19, %5, %cst_12 {dimension_numbers = #tpu.dot_dimension_numbers<[2], [1], [1], [2], [0, 0, 0, 1, 1, 2], [0], [0]>} : vector<2x8x8xbf16>, vector<2x8x64xbf16>, vector<2x8x64xf32> -> vector<2x8x64xf32>
    "tpu.trace_stop"() : () -> ()
    %c0_13 = arith.constant 0 : index
    %c0_14 = arith.constant 0 : index
    %c0_15 = arith.constant 0 : index
    %21 = vector.load %arg8[%c0_13, %c0_14, %c0_15] : memref<2x8x128xf32, #tpu.memory_space<vmem>>, vector<2x8x128xf32>
    %22 = arith.truncf %20 : vector<2x8x64xf32> to vector<2x8x64xbf16>
    %c0_16 = arith.constant 0 : index
    %c0_17 = arith.constant 0 : index
    %23 = vector.load %arg5[%c0_16, %c0_17] : memref<128x128xbf16, #tpu.memory_space<vmem>>, vector<64x128xbf16>
    "tpu.trace_start"() <{level = 10 : i32, message = "bsd,dn->bsn"}> : () -> ()
    %cst_18 = arith.constant dense<0.000000e+00> : vector<2x8x128xf32>
    %24 = tpu.matmul %22, %23, %cst_18 {dimension_numbers = #tpu.dot_dimension_numbers<[2], [0], [0, 1], [1], [0, 0, 0, 1, 1, 1], [], []>} : vector<2x8x64xbf16>, vector<64x128xbf16>, vector<2x8x128xf32> -> vector<2x8x128xf32>
    "tpu.trace_stop"() : () -> ()
    %25 = arith.addf %21, %24 : vector<2x8x128xf32>
    %c0_19 = arith.constant 0 : index
    %c0_20 = arith.constant 0 : index
    %c0_21 = arith.constant 0 : index
    %26 = vector.load %arg8[%c0_19, %c0_20, %c0_21] : memref<2x8x128xf32, #tpu.memory_space<vmem>>, vector<2x8x128xf32>
    tpu.vector_store %arg8[%c0_19, %c0_20, %c0_21], %25 {strides = array<i32>} : memref<2x8x128xf32, #tpu.memory_space<vmem>>, vector<2x8x128xf32>,
    %c0_22 = arith.constant 0 : index
    %c0_23 = arith.constant 0 : index
    %c64 = arith.constant 64 : index
    %27 = vector.load %arg2[%c0_22, %c0_23, %c64] : memref<2x8x128xbf16, #tpu.memory_space<vmem>>, vector<2x8x64xbf16>
    %c0_24 = arith.constant 0 : index
    %c0_25 = arith.constant 0 : index
    %c64_26 = arith.constant 64 : index
    %28 = vector.load %arg3[%c0_24, %c0_25, %c64_26] : memref<2x8x128xbf16, #tpu.memory_space<vmem>>, vector<2x8x64xbf16>
    %c0_27 = arith.constant 0 : index
    %c0_28 = arith.constant 0 : index
    %c64_29 = arith.constant 64 : index
    %29 = vector.load %arg4[%c0_27, %c0_28, %c64_29] : memref<2x8x128xbf16, #tpu.memory_space<vmem>>, vector<2x8x64xbf16>
    "tpu.trace_start"() <{level = 10 : i32, message = "bqd,bkd->bqk"}> : () -> ()
    %cst_30 = arith.constant dense<0.000000e+00> : vector<2x8x8xf32>
    %30 = tpu.matmul %27, %28, %cst_30 {dimension_numbers = #tpu.dot_dimension_numbers<[2], [2], [1], [1], [0, 0, 0, 1, 1, 1], [0], [0]>} : vector<2x8x64xbf16>, vector<2x8x64xbf16>, vector<2x8x8xf32> -> vector<2x8x8xf32>
    "tpu.trace_stop"() : () -> ()
    %cst_31 = arith.constant 1.250000e-01 : f32
    %31 = vector.broadcast %cst_31 : f32 to vector<2x8x8xf32>
    %32 = arith.mulf %30, %31 : vector<2x8x8xf32>
    %cst_32 = arith.constant dense<0xFF800000> : vector<2x8xf32>
    %33 = vector.multi_reduction <maximumf>, %32, %cst_32 [2] : vector<2x8x8xf32> to vector<2x8xf32>
    %34 = vector.shape_cast %33 : vector<2x8xf32> to vector<2x8x1xf32>
    %35 = vector.broadcast %34 : vector<2x8x1xf32> to vector<2x8x8xf32>
    %36 = arith.subf %32, %35 : vector<2x8x8xf32>
    %37 = math.exp %36 : vector<2x8x8xf32>
    %cst_33 = arith.constant dense<0.000000e+00> : vector<2x8xf32>
    %38 = vector.multi_reduction <add>, %37, %cst_33 [2] : vector<2x8x8xf32> to vector<2x8xf32>
    %39 = vector.shape_cast %38 : vector<2x8xf32> to vector<2x8x1xf32>
    %40 = tpu.reciprocal %39 {approx = true} : vector<2x8x1xf32> -> vector<2x8x1xf32>
    %41 = vector.broadcast %40 : vector<2x8x1xf32> to vector<2x8x8xf32>
    %42 = arith.mulf %37, %41 : vector<2x8x8xf32>
    %43 = arith.truncf %42 : vector<2x8x8xf32> to vector<2x8x8xbf16>
    "tpu.trace_start"() <{level = 10 : i32, message = "bqk,bkd->bqd"}> : () -> ()
    %cst_34 = arith.constant dense<0.000000e+00> : vector<2x8x64xf32>
    %44 = tpu.matmul %43, %29, %cst_34 {dimension_numbers = #tpu.dot_dimension_numbers<[2], [1], [1], [2], [0, 0, 0, 1, 1, 2], [0], [0]>} : vector<2x8x8xbf16>, vector<2x8x64xbf16>, vector<2x8x64xf32> -> vector<2x8x64xf32>
    "tpu.trace_stop"() : () -> ()
    %c0_35 = arith.constant 0 : index
    %c0_36 = arith.constant 0 : index
    %c0_37 = arith.constant 0 : index
    %45 = vector.load %arg8[%c0_35, %c0_36, %c0_37] : memref<2x8x128xf32, #tpu.memory_space<vmem>>, vector<2x8x128xf32>
    %46 = arith.truncf %44 : vector<2x8x64xf32> to vector<2x8x64xbf16>
    %c64_38 = arith.constant 64 : index
    %c0_39 = arith.constant 0 : index
    %47 = vector.load %arg5[%c64_38, %c0_39] : memref<128x128xbf16, #tpu.memory_space<vmem>>, vector<64x128xbf16>
    "tpu.trace_start"() <{level = 10 : i32, message = "bsd,dn->bsn"}> : () -> ()
    %cst_40 = arith.constant dense<0.000000e+00> : vector<2x8x128xf32>
    %48 = tpu.matmul %46, %47, %cst_40 {dimension_numbers = #tpu.dot_dimension_numbers<[2], [0], [0, 1], [1], [0, 0, 0, 1, 1, 1], [], []>} : vector<2x8x64xbf16>, vector<64x128xbf16>, vector<2x8x128xf32> -> vector<2x8x128xf32>
    "tpu.trace_stop"() : () -> ()
    %49 = arith.addf %45, %48 : vector<2x8x128xf32>
    %c0_41 = arith.constant 0 : index
    %c0_42 = arith.constant 0 : index
    %c0_43 = arith.constant 0 : index
    %50 = vector.load %arg8[%c0_41, %c0_42, %c0_43] : memref<2x8x128xf32, #tpu.memory_space<vmem>>, vector<2x8x128xf32>
    tpu.vector_store %arg8[%c0_41, %c0_42, %c0_43], %49 {strides = array<i32>} : memref<2x8x128xf32, #tpu.memory_space<vmem>>, vector<2x8x128xf32>,
    %c0_i32_44 = arith.constant 0 : i32
    %51 = arith.cmpi eq, %arg1, %c0_i32_44 : i32
    %52 = arith.extui %51 : i1 to i32
    %c0_i32_45 = arith.constant 0 : i32
    %53 = arith.cmpi ne, %52, %c0_i32_45 : i32
    scf.if %53 {
      %c0_46 = arith.constant 0 : index
      %c0_47 = arith.constant 0 : index
      %c0_48 = arith.constant 0 : index
      %54 = vector.load %arg8[%c0_46, %c0_47, %c0_48] : memref<2x8x128xf32, #tpu.memory_space<vmem>>, vector<2x8x128xf32>
      %c0_49 = arith.constant 0 : index
      %c0_50 = arith.constant 0 : index
      %55 = vector.load %arg6[%c0_49, %c0_50] : memref<1x128xf32, #tpu.memory_space<vmem>>, vector<1x128xf32>
      %56 = vector.shape_cast %55 : vector<1x128xf32> to vector<1x1x128xf32>
      %57 = vector.broadcast %56 : vector<1x1x128xf32> to vector<2x8x128xf32>
      %58 = arith.addf %54, %57 : vector<2x8x128xf32>
      %59 = arith.truncf %58 : vector<2x8x128xf32> to vector<2x8x128xbf16>
      %c0_51 = arith.constant 0 : index
      %c0_52 = arith.constant 0 : index
      %c0_53 = arith.constant 0 : index
      %60 = vector.load %arg7[%c0_51, %c0_52, %c0_53] : memref<2x8x128xbf16, #tpu.memory_space<vmem>>, vector<2x8x128xbf16>
      tpu.vector_store %arg7[%c0_51, %c0_52, %c0_53], %59 {strides = array<i32>} : memref<2x8x128xbf16, #tpu.memory_space<vmem>>, vector<2x8x128xbf16>,
    } else {
    }
    return
  }
  func.func @transform_0(%arg0: i32, %arg1: i32) -> (i32, i32, i32) {
    %c0_i32 = arith.constant 0 : i32
    %c0_i32_0 = arith.constant 0 : i32
    return %arg0, %c0_i32, %arg1 : i32, i32, i32
  }
  func.func @transform_1(%arg0: i32, %arg1: i32) -> (i32, i32, i32) {
    %c1_i32 = arith.constant 1 : i32
    %0 = arith.addi %c1_i32, %arg1 : i32
    %c0_i32 = arith.constant 0 : i32
    %c0_i32_0 = arith.constant 0 : i32
    return %arg0, %c0_i32, %0 : i32, i32, i32
  }
  func.func @transform_2(%arg0: i32, %arg1: i32) -> (i32, i32, i32) {
    %c2_i32 = arith.constant 2 : i32
    %0 = arith.addi %c2_i32, %arg1 : i32
    %c0_i32 = arith.constant 0 : i32
    %c0_i32_0 = arith.constant 0 : i32
    return %arg0, %c0_i32, %0 : i32, i32, i32
  }
  func.func @transform_3(%arg0: i32, %arg1: i32) -> (i32, i32) {
    %c0_i32 = arith.constant 0 : i32
    %c0_i32_0 = arith.constant 0 : i32
    return %arg1, %c0_i32 : i32, i32
  }
  func.func @transform_4(%arg0: i32, %arg1: i32) -> (i32, i32) {
    %c0_i32 = arith.constant 0 : i32
    %c0_i32_0 = arith.constant 0 : i32
    %c0_i32_1 = arith.constant 0 : i32
    return %c0_i32, %c0_i32_0 : i32, i32
  }
  func.func @transform_5(%arg0: i32, %arg1: i32) -> (i32, i32, i32) {
    %c0_i32 = arith.constant 0 : i32
    %c0_i32_0 = arith.constant 0 : i32
    %c0_i32_1 = arith.constant 0 : i32
    return %arg0, %c0_i32, %c0_i32_0 : i32, i32, i32
  }
}

module attributes {stable_mosaic.version = 11 : i64} {
  func.func @_add_layernorm_kernel(%arg0: i32, %arg1: memref<16x128xbf16, #tpu.memory_space<vmem>>, %arg2: memref<16x128xbf16, #tpu.memory_space<vmem>>, %arg3: memref<1x128xf32, #tpu.memory_space<vmem>>, %arg4: memref<1x128xf32, #tpu.memory_space<vmem>>, %arg5: memref<16x128xbf16, #tpu.memory_space<vmem>>) attributes {dimension_semantics = [#tpu.dimension_semantics<parallel>], iteration_bounds = array<i64: 2>, scalar_prefetch = 0 : i64, scratch_operands = 0 : i64, tpu.core_type = #tpu.core_type<tc>, window_params = [{transform_indices = @transform_0, window_bounds = array<i64: 16, 128>}, {transform_indices = @transform_1, window_bounds = array<i64: 16, 128>}, {pipeline_mode = #tpu.pipeline_mode<synchronous>, transform_indices = @transform_2, window_bounds = array<i64: 1, 128>}, {pipeline_mode = #tpu.pipeline_mode<synchronous>, transform_indices = @transform_3, window_bounds = array<i64: 1, 128>}, {transform_indices = @transform_4, window_bounds = array<i64: 16, 128>}]} {
    %c0 = arith.constant 0 : index
    %c0_0 = arith.constant 0 : index
    %0 = vector.load %arg1[%c0, %c0_0] : memref<16x128xbf16, #tpu.memory_space<vmem>>, vector<16x128xbf16>
    %1 = arith.extf %0 : vector<16x128xbf16> to vector<16x128xf32>
    %c0_1 = arith.constant 0 : index
    %c0_2 = arith.constant 0 : index
    %2 = vector.load %arg2[%c0_1, %c0_2] : memref<16x128xbf16, #tpu.memory_space<vmem>>, vector<16x128xbf16>
    %3 = arith.extf %2 : vector<16x128xbf16> to vector<16x128xf32>
    %4 = arith.addf %1, %3 : vector<16x128xf32>
    %c0_3 = arith.constant 0 : index
    %c0_4 = arith.constant 0 : index
    %5 = vector.load %arg3[%c0_3, %c0_4] : memref<1x128xf32, #tpu.memory_space<vmem>>, vector<1x128xf32>
    %c0_5 = arith.constant 0 : index
    %c0_6 = arith.constant 0 : index
    %6 = vector.load %arg4[%c0_5, %c0_6] : memref<1x128xf32, #tpu.memory_space<vmem>>, vector<1x128xf32>
    %cst = arith.constant dense<0.000000e+00> : vector<16xf32>
    %7 = vector.multi_reduction <add>, %4, %cst [1] : vector<16x128xf32> to vector<16xf32>
    %8 = vector.shape_cast %7 : vector<16xf32> to vector<16x1xf32>
    %cst_7 = arith.constant 1.280000e+02 : f32
    %9 = vector.broadcast %cst_7 : f32 to vector<16x1xf32>
    %10 = arith.divf %8, %9 : vector<16x1xf32>
    %11 = vector.broadcast %10 : vector<16x1xf32> to vector<16x128xf32>
    %12 = arith.subf %4, %11 : vector<16x128xf32>
    %13 = arith.mulf %12, %12 : vector<16x128xf32>
    %cst_8 = arith.constant dense<0.000000e+00> : vector<16xf32>
    %14 = vector.multi_reduction <add>, %13, %cst_8 [1] : vector<16x128xf32> to vector<16xf32>
    %15 = vector.shape_cast %14 : vector<16xf32> to vector<16x1xf32>
    %cst_9 = arith.constant 1.280000e+02 : f32
    %16 = vector.broadcast %cst_9 : f32 to vector<16x1xf32>
    %17 = arith.divf %15, %16 : vector<16x1xf32>
    %18 = vector.broadcast %10 : vector<16x1xf32> to vector<16x128xf32>
    %19 = arith.subf %4, %18 : vector<16x128xf32>
    %cst_10 = arith.constant 9.99999996E-13 : f32
    %20 = vector.broadcast %cst_10 : f32 to vector<16x1xf32>
    %21 = arith.addf %17, %20 : vector<16x1xf32>
    %22 = math.rsqrt %21 : vector<16x1xf32>
    %23 = vector.broadcast %22 : vector<16x1xf32> to vector<16x128xf32>
    %24 = arith.mulf %19, %23 : vector<16x128xf32>
    %25 = vector.broadcast %5 : vector<1x128xf32> to vector<16x128xf32>
    %26 = arith.mulf %24, %25 : vector<16x128xf32>
    %27 = vector.broadcast %6 : vector<1x128xf32> to vector<16x128xf32>
    %28 = arith.addf %26, %27 : vector<16x128xf32>
    %29 = arith.truncf %28 : vector<16x128xf32> to vector<16x128xbf16>
    %c0_11 = arith.constant 0 : index
    %c0_12 = arith.constant 0 : index
    %30 = vector.load %arg5[%c0_11, %c0_12] : memref<16x128xbf16, #tpu.memory_space<vmem>>, vector<16x128xbf16>
    tpu.vector_store %arg5[%c0_11, %c0_12], %29 {strides = array<i32>} : memref<16x128xbf16, #tpu.memory_space<vmem>>, vector<16x128xbf16>,
    return
  }
  func.func @transform_0(%arg0: i32) -> (i32, i32) {
    %c0_i32 = arith.constant 0 : i32
    %c0_i32_0 = arith.constant 0 : i32
    return %arg0, %c0_i32 : i32, i32
  }
  func.func @transform_1(%arg0: i32) -> (i32, i32) {
    %c0_i32 = arith.constant 0 : i32
    %c0_i32_0 = arith.constant 0 : i32
    return %arg0, %c0_i32 : i32, i32
  }
  func.func @transform_2(%arg0: i32) -> (i32, i32) {
    %c0_i32 = arith.constant 0 : i32
    %c0_i32_0 = arith.constant 0 : i32
    %c0_i32_1 = arith.constant 0 : i32
    return %c0_i32, %c0_i32_0 : i32, i32
  }
  func.func @transform_3(%arg0: i32) -> (i32, i32) {
    %c0_i32 = arith.constant 0 : i32
    %c0_i32_0 = arith.constant 0 : i32
    %c0_i32_1 = arith.constant 0 : i32
    return %c0_i32, %c0_i32_0 : i32, i32
  }
  func.func @transform_4(%arg0: i32) -> (i32, i32) {
    %c0_i32 = arith.constant 0 : i32
    %c0_i32_0 = arith.constant 0 : i32
    return %arg0, %c0_i32 : i32, i32
  }
}

module attributes {stable_mosaic.version = 11 : i64} {
  func.func @_linear_kernel(%arg0: i32, %arg1: i32, %arg2: i32, %arg3: memref<16x256xbf16, #tpu.memory_space<vmem>>, %arg4: memref<256x128xbf16, #tpu.memory_space<vmem>>, %arg5: memref<1x128xf32, #tpu.memory_space<vmem>>, %arg6: memref<16x128xbf16, #tpu.memory_space<vmem>>, %arg7: memref<16x128xf32, #tpu.memory_space<vmem>>) attributes {dimension_semantics = [#tpu.dimension_semantics<parallel>, #tpu.dimension_semantics<parallel>, #tpu.dimension_semantics<arbitrary>], iteration_bounds = array<i64: 2, 1, 1>, scalar_prefetch = 0 : i64, scratch_operands = 1 : i64, tpu.core_type = #tpu.core_type<tc>, window_params = [{transform_indices = @transform_0, window_bounds = array<i64: 16, 256>}, {transform_indices = @transform_1, window_bounds = array<i64: 256, 128>}, {transform_indices = @transform_2, window_bounds = array<i64: 1, 128>}, {transform_indices = @transform_3, window_bounds = array<i64: 16, 128>}]} {
    %c0_i32 = arith.constant 0 : i32
    %0 = arith.cmpi eq, %arg2, %c0_i32 : i32
    %1 = arith.extui %0 : i1 to i32
    %c0_i32_0 = arith.constant 0 : i32
    %2 = arith.cmpi ne, %1, %c0_i32_0 : i32
    scf.if %2 {
      %cst_10 = arith.constant 0.000000e+00 : f32
      %12 = vector.broadcast %cst_10 : f32 to vector<16x128xf32>
      %c0_11 = arith.constant 0 : index
      %c0_12 = arith.constant 0 : index
      %13 = vector.load %arg7[%c0_11, %c0_12] : memref<16x128xf32, #tpu.memory_space<vmem>>, vector<16x128xf32>
      tpu.vector_store %arg7[%c0_11, %c0_12], %12 {strides = array<i32>} : memref<16x128xf32, #tpu.memory_space<vmem>>, vector<16x128xf32>,
    } else {
    }
    %c0 = arith.constant 0 : index
    %c0_1 = arith.constant 0 : index
    %3 = vector.load %arg7[%c0, %c0_1] : memref<16x128xf32, #tpu.memory_space<vmem>>, vector<16x128xf32>
    %c0_2 = arith.constant 0 : index
    %c0_3 = arith.constant 0 : index
    %4 = vector.load %arg3[%c0_2, %c0_3] : memref<16x256xbf16, #tpu.memory_space<vmem>>, vector<16x256xbf16>
    %c0_4 = arith.constant 0 : index
    %c0_5 = arith.constant 0 : index
    %5 = vector.load %arg4[%c0_4, %c0_5] : memref<256x128xbf16, #tpu.memory_space<vmem>>, vector<256x128xbf16>
    %cst = arith.constant dense<0.000000e+00> : vector<16x128xf32>
    %6 = tpu.matmul %4, %5, %cst {dimension_numbers = #tpu.dot_dimension_numbers<[1], [0], [0], [1], [0, 0, 1, 1], [], []>} : vector<16x256xbf16>, vector<256x128xbf16>, vector<16x128xf32> -> vector<16x128xf32>
    %7 = arith.addf %3, %6 : vector<16x128xf32>
    %c0_6 = arith.constant 0 : index
    %c0_7 = arith.constant 0 : index
    %8 = vector.load %arg7[%c0_6, %c0_7] : memref<16x128xf32, #tpu.memory_space<vmem>>, vector<16x128xf32>
    tpu.vector_store %arg7[%c0_6, %c0_7], %7 {strides = array<i32>} : memref<16x128xf32, #tpu.memory_space<vmem>>, vector<16x128xf32>,
    %c0_i32_8 = arith.constant 0 : i32
    %9 = arith.cmpi eq, %arg2, %c0_i32_8 : i32
    %10 = arith.extui %9 : i1 to i32
    %c0_i32_9 = arith.constant 0 : i32
    %11 = arith.cmpi ne, %10, %c0_i32_9 : i32
    scf.if %11 {
      %c0_10 = arith.constant 0 : index
      %c0_11 = arith.constant 0 : index
      %12 = vector.load %arg7[%c0_10, %c0_11] : memref<16x128xf32, #tpu.memory_space<vmem>>, vector<16x128xf32>
      %c0_12 = arith.constant 0 : index
      %c0_13 = arith.constant 0 : index
      %13 = vector.load %arg5[%c0_12, %c0_13] : memref<1x128xf32, #tpu.memory_space<vmem>>, vector<1x128xf32>
      %14 = vector.broadcast %13 : vector<1x128xf32> to vector<16x128xf32>
      %15 = arith.addf %12, %14 : vector<16x128xf32>
      %16 = arith.truncf %15 : vector<16x128xf32> to vector<16x128xbf16>
      %c0_14 = arith.constant 0 : index
      %c0_15 = arith.constant 0 : index
      %17 = vector.load %arg6[%c0_14, %c0_15] : memref<16x128xbf16, #tpu.memory_space<vmem>>, vector<16x128xbf16>
      tpu.vector_store %arg6[%c0_14, %c0_15], %16 {strides = array<i32>} : memref<16x128xbf16, #tpu.memory_space<vmem>>, vector<16x128xbf16>,
    } else {
    }
    return
  }
  func.func @transform_0(%arg0: i32, %arg1: i32, %arg2: i32) -> (i32, i32) {
    %c0_i32 = arith.constant 0 : i32
    return %arg0, %arg2 : i32, i32
  }
  func.func @transform_1(%arg0: i32, %arg1: i32, %arg2: i32) -> (i32, i32) {
    %c0_i32 = arith.constant 0 : i32
    return %arg2, %arg1 : i32, i32
  }
  func.func @transform_2(%arg0: i32, %arg1: i32, %arg2: i32) -> (i32, i32) {
    %c0_i32 = arith.constant 0 : i32
    %c0_i32_0 = arith.constant 0 : i32
    return %c0_i32, %arg1 : i32, i32
  }
  func.func @transform_3(%arg0: i32, %arg1: i32, %arg2: i32) -> (i32, i32) {
    %c0_i32 = arith.constant 0 : i32
    return %arg0, %arg1 : i32, i32
  }
}

module attributes {stable_mosaic.version = 11 : i64} {
  func.func @_linear_kernel(%arg0: i32, %arg1: i32, %arg2: i32, %arg3: memref<16x128xbf16, #tpu.memory_space<vmem>>, %arg4: memref<128x256xbf16, #tpu.memory_space<vmem>>, %arg5: memref<1x256xf32, #tpu.memory_space<vmem>>, %arg6: memref<16x256xbf16, #tpu.memory_space<vmem>>, %arg7: memref<16x256xf32, #tpu.memory_space<vmem>>) attributes {dimension_semantics = [#tpu.dimension_semantics<parallel>, #tpu.dimension_semantics<parallel>, #tpu.dimension_semantics<arbitrary>], iteration_bounds = array<i64: 2, 1, 1>, scalar_prefetch = 0 : i64, scratch_operands = 1 : i64, tpu.core_type = #tpu.core_type<tc>, window_params = [{transform_indices = @transform_0, window_bounds = array<i64: 16, 128>}, {transform_indices = @transform_1, window_bounds = array<i64: 128, 256>}, {transform_indices = @transform_2, window_bounds = array<i64: 1, 256>}, {transform_indices = @transform_3, window_bounds = array<i64: 16, 256>}]} {
    %c0_i32 = arith.constant 0 : i32
    %0 = arith.cmpi eq, %arg2, %c0_i32 : i32
    %1 = arith.extui %0 : i1 to i32
    %c0_i32_0 = arith.constant 0 : i32
    %2 = arith.cmpi ne, %1, %c0_i32_0 : i32
    scf.if %2 {
      %cst_10 = arith.constant 0.000000e+00 : f32
      %12 = vector.broadcast %cst_10 : f32 to vector<16x256xf32>
      %c0_11 = arith.constant 0 : index
      %c0_12 = arith.constant 0 : index
      %13 = vector.load %arg7[%c0_11, %c0_12] : memref<16x256xf32, #tpu.memory_space<vmem>>, vector<16x256xf32>
      tpu.vector_store %arg7[%c0_11, %c0_12], %12 {strides = array<i32>} : memref<16x256xf32, #tpu.memory_space<vmem>>, vector<16x256xf32>,
    } else {
    }
    %c0 = arith.constant 0 : index
    %c0_1 = arith.constant 0 : index
    %3 = vector.load %arg7[%c0, %c0_1] : memref<16x256xf32, #tpu.memory_space<vmem>>, vector<16x256xf32>
    %c0_2 = arith.constant 0 : index
    %c0_3 = arith.constant 0 : index
    %4 = vector.load %arg3[%c0_2, %c0_3] : memref<16x128xbf16, #tpu.memory_space<vmem>>, vector<16x128xbf16>
    %c0_4 = arith.constant 0 : index
    %c0_5 = arith.constant 0 : index
    %5 = vector.load %arg4[%c0_4, %c0_5] : memref<128x256xbf16, #tpu.memory_space<vmem>>, vector<128x256xbf16>
    %cst = arith.constant dense<0.000000e+00> : vector<16x256xf32>
    %6 = tpu.matmul %4, %5, %cst {dimension_numbers = #tpu.dot_dimension_numbers<[1], [0], [0], [1], [0, 0, 1, 1], [], []>} : vector<16x128xbf16>, vector<128x256xbf16>, vector<16x256xf32> -> vector<16x256xf32>
    %7 = arith.addf %3, %6 : vector<16x256xf32>
    %c0_6 = arith.constant 0 : index
    %c0_7 = arith.constant 0 : index
    %8 = vector.load %arg7[%c0_6, %c0_7] : memref<16x256xf32, #tpu.memory_space<vmem>>, vector<16x256xf32>
    tpu.vector_store %arg7[%c0_6, %c0_7], %7 {strides = array<i32>} : memref<16x256xf32, #tpu.memory_space<vmem>>, vector<16x256xf32>,
    %c0_i32_8 = arith.constant 0 : i32
    %9 = arith.cmpi eq, %arg2, %c0_i32_8 : i32
    %10 = arith.extui %9 : i1 to i32
    %c0_i32_9 = arith.constant 0 : i32
    %11 = arith.cmpi ne, %10, %c0_i32_9 : i32
    scf.if %11 {
      %c0_10 = arith.constant 0 : index
      %c0_11 = arith.constant 0 : index
      %12 = vector.load %arg7[%c0_10, %c0_11] : memref<16x256xf32, #tpu.memory_space<vmem>>, vector<16x256xf32>
      %c0_12 = arith.constant 0 : index
      %c0_13 = arith.constant 0 : index
      %13 = vector.load %arg5[%c0_12, %c0_13] : memref<1x256xf32, #tpu.memory_space<vmem>>, vector<1x256xf32>
      %14 = vector.broadcast %13 : vector<1x256xf32> to vector<16x256xf32>
      %15 = arith.addf %12, %14 : vector<16x256xf32>
      %16 = arith.mulf %15, %15 : vector<16x256xf32>
      %17 = arith.mulf %15, %16 : vector<16x256xf32>
      %cst_14 = arith.constant 4.471500e-02 : f32
      %18 = vector.broadcast %cst_14 : f32 to vector<16x256xf32>
      %19 = arith.mulf %18, %17 : vector<16x256xf32>
      %20 = arith.addf %15, %19 : vector<16x256xf32>
      %cst_15 = arith.constant 0.797884583 : f32
      %21 = vector.broadcast %cst_15 : f32 to vector<16x256xf32>
      %22 = arith.mulf %21, %20 : vector<16x256xf32>
      %23 = math.tanh %22 : vector<16x256xf32>
      %cst_16 = arith.constant 1.000000e+00 : f32
      %24 = vector.broadcast %cst_16 : f32 to vector<16x256xf32>
      %25 = arith.addf %24, %23 : vector<16x256xf32>
      %cst_17 = arith.constant 5.000000e-01 : f32
      %26 = vector.broadcast %cst_17 : f32 to vector<16x256xf32>
      %27 = arith.mulf %26, %25 : vector<16x256xf32>
      %28 = arith.mulf %15, %27 : vector<16x256xf32>
      %29 = arith.truncf %28 : vector<16x256xf32> to vector<16x256xbf16>
      %c0_18 = arith.constant 0 : index
      %c0_19 = arith.constant 0 : index
      %30 = vector.load %arg6[%c0_18, %c0_19] : memref<16x256xbf16, #tpu.memory_space<vmem>>, vector<16x256xbf16>
      tpu.vector_store %arg6[%c0_18, %c0_19], %29 {strides = array<i32>} : memref<16x256xbf16, #tpu.memory_space<vmem>>, vector<16x256xbf16>,
    } else {
    }
    return
  }
  func.func @transform_0(%arg0: i32, %arg1: i32, %arg2: i32) -> (i32, i32) {
    %c0_i32 = arith.constant 0 : i32
    return %arg0, %arg2 : i32, i32
  }
  func.func @transform_1(%arg0: i32, %arg1: i32, %arg2: i32) -> (i32, i32) {
    %c0_i32 = arith.constant 0 : i32
    return %arg2, %arg1 : i32, i32
  }
  func.func @transform_2(%arg0: i32, %arg1: i32, %arg2: i32) -> (i32, i32) {
    %c0_i32 = arith.constant 0 : i32
    %c0_i32_0 = arith.constant 0 : i32
    return %c0_i32, %arg1 : i32, i32
  }
  func.func @transform_3(%arg0: i32, %arg1: i32, %arg2: i32) -> (i32, i32) {
    %c0_i32 = arith.constant 0 : i32
    return %arg0, %arg1 : i32, i32
  }
}

module attributes {stable_mosaic.version = 11 : i64} {
  func.func @_linear_kernel(%arg0: i32, %arg1: i32, %arg2: i32, %arg3: memref<4x128xbf16, #tpu.memory_space<vmem>>, %arg4: memref<128x128xbf16, #tpu.memory_space<vmem>>, %arg5: memref<1x128xf32, #tpu.memory_space<vmem>>, %arg6: memref<4x128xbf16, #tpu.memory_space<vmem>>, %arg7: memref<4x128xf32, #tpu.memory_space<vmem>>) attributes {dimension_semantics = [#tpu.dimension_semantics<parallel>, #tpu.dimension_semantics<parallel>, #tpu.dimension_semantics<arbitrary>], iteration_bounds = array<i64: 1, 1, 1>, scalar_prefetch = 0 : i64, scratch_operands = 1 : i64, tpu.core_type = #tpu.core_type<tc>, window_params = [{transform_indices = @transform_0, window_bounds = array<i64: 4, 128>}, {transform_indices = @transform_1, window_bounds = array<i64: 128, 128>}, {transform_indices = @transform_2, window_bounds = array<i64: 1, 128>}, {transform_indices = @transform_3, window_bounds = array<i64: 4, 128>}]} {
    %c0_i32 = arith.constant 0 : i32
    %0 = arith.cmpi eq, %arg2, %c0_i32 : i32
    %1 = arith.extui %0 : i1 to i32
    %c0_i32_0 = arith.constant 0 : i32
    %2 = arith.cmpi ne, %1, %c0_i32_0 : i32
    scf.if %2 {
      %cst_10 = arith.constant 0.000000e+00 : f32
      %12 = vector.broadcast %cst_10 : f32 to vector<4x128xf32>
      %c0_11 = arith.constant 0 : index
      %c0_12 = arith.constant 0 : index
      %13 = vector.load %arg7[%c0_11, %c0_12] : memref<4x128xf32, #tpu.memory_space<vmem>>, vector<4x128xf32>
      tpu.vector_store %arg7[%c0_11, %c0_12], %12 {strides = array<i32>} : memref<4x128xf32, #tpu.memory_space<vmem>>, vector<4x128xf32>,
    } else {
    }
    %c0 = arith.constant 0 : index
    %c0_1 = arith.constant 0 : index
    %3 = vector.load %arg7[%c0, %c0_1] : memref<4x128xf32, #tpu.memory_space<vmem>>, vector<4x128xf32>
    %c0_2 = arith.constant 0 : index
    %c0_3 = arith.constant 0 : index
    %4 = vector.load %arg3[%c0_2, %c0_3] : memref<4x128xbf16, #tpu.memory_space<vmem>>, vector<4x128xbf16>
    %c0_4 = arith.constant 0 : index
    %c0_5 = arith.constant 0 : index
    %5 = vector.load %arg4[%c0_4, %c0_5] : memref<128x128xbf16, #tpu.memory_space<vmem>>, vector<128x128xbf16>
    %cst = arith.constant dense<0.000000e+00> : vector<4x128xf32>
    %6 = tpu.matmul %4, %5, %cst {dimension_numbers = #tpu.dot_dimension_numbers<[1], [0], [0], [1], [0, 0, 1, 1], [], []>} : vector<4x128xbf16>, vector<128x128xbf16>, vector<4x128xf32> -> vector<4x128xf32>
    %7 = arith.addf %3, %6 : vector<4x128xf32>
    %c0_6 = arith.constant 0 : index
    %c0_7 = arith.constant 0 : index
    %8 = vector.load %arg7[%c0_6, %c0_7] : memref<4x128xf32, #tpu.memory_space<vmem>>, vector<4x128xf32>
    tpu.vector_store %arg7[%c0_6, %c0_7], %7 {strides = array<i32>} : memref<4x128xf32, #tpu.memory_space<vmem>>, vector<4x128xf32>,
    %c0_i32_8 = arith.constant 0 : i32
    %9 = arith.cmpi eq, %arg2, %c0_i32_8 : i32
    %10 = arith.extui %9 : i1 to i32
    %c0_i32_9 = arith.constant 0 : i32
    %11 = arith.cmpi ne, %10, %c0_i32_9 : i32
    scf.if %11 {
      %c0_10 = arith.constant 0 : index
      %c0_11 = arith.constant 0 : index
      %12 = vector.load %arg7[%c0_10, %c0_11] : memref<4x128xf32, #tpu.memory_space<vmem>>, vector<4x128xf32>
      %c0_12 = arith.constant 0 : index
      %c0_13 = arith.constant 0 : index
      %13 = vector.load %arg5[%c0_12, %c0_13] : memref<1x128xf32, #tpu.memory_space<vmem>>, vector<1x128xf32>
      %14 = vector.broadcast %13 : vector<1x128xf32> to vector<4x128xf32>
      %15 = arith.addf %12, %14 : vector<4x128xf32>
      %16 = math.tanh %15 : vector<4x128xf32>
      %17 = arith.truncf %16 : vector<4x128xf32> to vector<4x128xbf16>
      %c0_14 = arith.constant 0 : index
      %c0_15 = arith.constant 0 : index
      %18 = vector.load %arg6[%c0_14, %c0_15] : memref<4x128xbf16, #tpu.memory_space<vmem>>, vector<4x128xbf16>
      tpu.vector_store %arg6[%c0_14, %c0_15], %17 {strides = array<i32>} : memref<4x128xbf16, #tpu.memory_space<vmem>>, vector<4x128xbf16>,
    } else {
    }
    return
  }
  func.func @transform_0(%arg0: i32, %arg1: i32, %arg2: i32) -> (i32, i32) {
    %c0_i32 = arith.constant 0 : i32
    return %arg0, %arg2 : i32, i32
  }
  func.func @transform_1(%arg0: i32, %arg1: i32, %arg2: i32) -> (i32, i32) {
    %c0_i32 = arith.constant 0 : i32
    return %arg2, %arg1 : i32, i32
  }
  func.func @transform_2(%arg0: i32, %arg1: i32, %arg2: i32) -> (i32, i32) {
    %c0_i32 = arith.constant 0 : i32
    %c0_i32_0 = arith.constant 0 : i32
    return %c0_i32, %arg1 : i32, i32
  }
  func.func @transform_3(%arg0: i32, %arg1: i32, %arg2: i32) -> (i32, i32) {
    %c0_i32 = arith.constant 0 : i32
    return %arg0, %arg1 : i32, i32
  }
}

module attributes {stable_mosaic.version = 11 : i64} {
  func.func @_head_kernel(%arg0: memref<4x128xbf16, #tpu.memory_space<vmem>>, %arg1: memref<128x128xbf16, #tpu.memory_space<vmem>>, %arg2: memref<1x128xf32, #tpu.memory_space<vmem>>, %arg3: memref<4x128xf32, #tpu.memory_space<vmem>>, %arg4: memref<4x1xf32, #tpu.memory_space<vmem>>) attributes {dimension_semantics = [], scalar_prefetch = 0 : i64, scratch_operands = 0 : i64, tpu.core_type = #tpu.core_type<tc>} {
    %c0 = arith.constant 0 : index
    %c0_0 = arith.constant 0 : index
    %0 = vector.load %arg0[%c0, %c0_0] : memref<4x128xbf16, #tpu.memory_space<vmem>>, vector<4x128xbf16>
    %c0_1 = arith.constant 0 : index
    %c0_2 = arith.constant 0 : index
    %1 = vector.load %arg1[%c0_1, %c0_2] : memref<128x128xbf16, #tpu.memory_space<vmem>>, vector<128x128xbf16>
    %cst = arith.constant dense<0.000000e+00> : vector<4x128xf32>
    %2 = tpu.matmul %0, %1, %cst {dimension_numbers = #tpu.dot_dimension_numbers<[1], [0], [0], [1], [0, 0, 1, 1], [], []>} : vector<4x128xbf16>, vector<128x128xbf16>, vector<4x128xf32> -> vector<4x128xf32>
    %c0_3 = arith.constant 0 : index
    %c0_4 = arith.constant 0 : index
    %3 = vector.load %arg2[%c0_3, %c0_4] : memref<1x128xf32, #tpu.memory_space<vmem>>, vector<1x128xf32>
    %4 = vector.broadcast %3 : vector<1x128xf32> to vector<4x128xf32>
    %5 = arith.addf %2, %4 : vector<4x128xf32>
    %6 = tpu.iota {dimensions = array<i32: 0>} : vector<4x128xi32>
    %c2_i32 = arith.constant 2 : i32
    %7 = vector.broadcast %c2_i32 : i32 to vector<4x128xi32>
    %8 = arith.cmpi sge, %6, %7 : vector<4x128xi32>
    %9 = arith.negf %5 : vector<4x128xf32>
    %10 = math.exp %9 : vector<4x128xf32>
    %cst_5 = arith.constant 1.000000e+00 : f32
    %11 = vector.broadcast %cst_5 : f32 to vector<4x128xf32>
    %12 = arith.addf %11, %10 : vector<4x128xf32>
    %13 = arith.divf %11, %12 : vector<4x128xf32>
    %14 = arith.select %8, %13, %5 : vector<4x128xi1>, vector<4x128xf32>
    %c0_6 = arith.constant 0 : index
    %c0_7 = arith.constant 0 : index
    %15 = vector.load %arg3[%c0_6, %c0_7] : memref<4x128xf32, #tpu.memory_space<vmem>>, vector<4x128xf32>
    %16 = arith.mulf %15, %14 : vector<4x128xf32>
    %cst_8 = arith.constant dense<0.000000e+00> : vector<4xf32>
    %17 = vector.multi_reduction <add>, %16, %cst_8 [1] : vector<4x128xf32> to vector<4xf32>
    %18 = vector.shape_cast %17 : vector<4xf32> to vector<4x1xf32>
    %c0_9 = arith.constant 0 : index
    %c0_10 = arith.constant 0 : index
    %19 = vector.load %arg4[%c0_9, %c0_10] : memref<4x1xf32, #tpu.memory_space<vmem>>, vector<4x1xf32>
    tpu.vector_store %arg4[%c0_9, %c0_10], %18 {strides = array<i32>} : memref<4x1xf32, #tpu.memory_space<vmem>>, vector<4x1xf32>,
    return
  }
}

</mosaic_0001>

<bundles_post_ra>
// kernel: caue_bert_forward.15
= control target key start
LH: loop header
LB: loop body
LE: loop exit
PB: predicated region body
PF: predicated region fallthrough
CT: control target
= control target key end

     0   :  { %s377_s15 = smov 0   ;;  %s410_s0 = inlined_call_operand.vmem [shape: bf16[4,8,128], index: 0, kind: input, shape index: {}]   ;;  %s411_s1 = inlined_call_operand.vmem [shape: bf16[8,128], index: 1, kind: input, shape index: {}]   ;;  %s412_s2 = inlined_call_operand.vmem [shape: f32[1,128], index: 2, kind: input, shape index: {}]   ;;  %s413_s3 = inlined_call_operand.vmem [shape: f32[1,128], index: 3, kind: input, shape index: {}]   ;;  %s414_s4 = inlined_call_operand.vmem [shape: bf16[4,8,128], index: 4, kind: output, shape index: {}]  }
   0x1 LB: > { %s310_s16 = sadd.s32 4294967295, %s350_s15   ;;  %p314_p0 = scmp.ge.s32.totalorder %s350_s15, 1  ;;  %s350_s15 = sphi %s377_s15, %s14_s15  }
   0x2   : > { %p163_p1 = scmp.lt.s32.totalorder %s350_s15, 3 }
   0x4   : > { %p164_p2 = pnand %p314_p0, %p163_p1 }
   0x5   : > { %s315_s17 = sshll.u32 (!%p164_p2), %s310_s16, 1 }
   0x6   : > { %167 = sbr.rel (%p164_p2) target bundleno = 332 (0x14c), region = 36  ;;  %p190_p3 = scmp.lt.s32.totalorder (!%p164_p2), %s315_s17, 3 }
   0xb   : > { %s416_s17 = smov (!%p190_p3, %s315_s17), 3  ;;  %v205_v0 = vld [vmem:[%s411_s1] sm:$0xf] }
   0xc   : > { %s316_s20 = sshll.u32 %s416_s17, 2  ;;  %v206_v1 = vunpack.c.l.bf16 %v205_v0  ;;  %v319_v23 = vld [vmem:[%s412_s2] ss:$0 sm:$0xff] }
   0xd   : > { %s193_s23 = scalar_lea.vmem %s410_s0, %s316_s20  ;;  %v320_v27 = vld [vmem:[%s413_s3] ss:$0 sm:$0xff]  ;;  %s199_s30 = scalar_lea.vmem %s414_s4, %s316_s20 }
   0xe   : > { %v324_v2 = vld [vmem:[%s193_s23] sm:$0xff]  }
   0xf   : > { %v325_v3 = vunpack.c.l.bf16 %v324_v2  ;;  %v326_v4 = vunpack.c.h.bf16 %v324_v2 }
  0x11   : > { %v207_v5 = vadd.f32 %v325_v3, %v206_v1  ;;  %v208_v6 = vadd.f32 %v326_v4, %v206_v1 }
  0x13   : > { %211 = vadd.xlane.f32.xlu0 %v207_v5 }
  0x17   : > { %213 = vadd.xlane.f32.xlu0 %v208_v6 }
  0x9c   : > { %v212_v7 = vpop.xlane.xlu0 %211 }
  0x9d   : > { %v216_v8 = vmul.f32 0.0078125, %v212_v7 }
  0x9f   : > { %v218_v9 = vsub.f32 %v207_v5, %v216_v8 }
  0xa0   : > { %v214_v10 = vpop.xlane.xlu0 %213 }
  0xa1   : > { %v217_v11 = vmul.f32 0.0078125, %v214_v10  ;;  %v220_v12 = vmul.f32 %v218_v9, %v218_v9 }
  0xa3   : > { %v219_v13 = vsub.f32 %v208_v6, %v217_v11  ;;  %222 = vadd.xlane.f32.xlu1 %v220_v12 }
  0xa5   : > { %v221_v14 = vmul.f32 %v219_v13, %v219_v13 }
  0xa7   : > { %224 = vadd.xlane.f32.xlu1 %v221_v14 }
 0x12c   : > { %v223_v15 = vpop.xlane.xlu1 %222 }
 0x12d   : > { %v226_v16 = vmul.f32 0.0078125, %v223_v15 }
 0x12f   : > { %v228_v17 = vadd.f32 1e-12, %v226_v16 }
 0x130   : > { %v225_v18 = vpop.xlane.xlu1 %224 }
 0x131   : > { %340 = vrsqrt.f32 %v228_v17  ;;  %v227_v19 = vmul.f32 0.0078125, %v225_v18 }
 0x133   : > { %v229_v20 = vadd.f32 1e-12, %v227_v19 }
 0x135   : > { %342 = vrsqrt.f32 %v229_v20 }
 0x13e   : > { %v341_v21 = vpop.eup %340 }
 0x13f   : > { %v232_v22 = vmul.f32 %v341_v21, %v218_v9 }
 0x141   : > { %v240_v25 = vmul.f32 %v319_v23, %v232_v22 }
 0x142   : > { %v343_v24 = vpop.eup %342 }
 0x143   : > { %v233_v26 = vmul.f32 %v343_v24, %v219_v13  ;;  %v248_v29 = vadd.f32 %v320_v27, %v240_v25 }
 0x145   : > { %v241_v28 = vmul.f32 %v319_v23, %v233_v26 }
 0x147   : > { %v249_v30 = vadd.f32 %v320_v27, %v241_v28 }
 0x149   : > { %v330_v31 = vpack.c.bf16 %v249_v30, %v248_v29 }
 0x14b   : > { %331 = vst [vmem:[%s199_s30] sm:$0xff] %v330_v31  }
 0x14c PF: > { %s14_s15 = sadd.s32 1, %s350_s15  }
 0x14d   : > { %p11_p4 = scmp.ge.s32.totalorder %s14_s15, 4  }
 0x14f   :  { %13 = sbr.rel (!%p11_p4) target bundleno = 1 (0x1), region = 66 }

// kernel: caue_bert_forward.18
= control target key start
LH: loop header
LB: loop body
LE: loop exit
PB: predicated region body
PF: predicated region fallthrough
CT: control target
= control target key end

     0   :  { %s429_s15 = smov 0   ;;  %s460_s0 = inlined_call_operand.vmem [shape: bf16[32,128], index: 0, kind: input, shape index: {}]   ;;  %s461_s1 = inlined_call_operand.vmem [shape: bf16[32,128], index: 1, kind: input, shape index: {}]   ;;  %s462_s2 = inlined_call_operand.vmem [shape: f32[1,128], index: 2, kind: input, shape index: {}]   ;;  %s463_s3 = inlined_call_operand.vmem [shape: f32[1,128], index: 3, kind: input, shape index: {}]   ;;  %s464_s4 = inlined_call_operand.vmem [shape: bf16[32,128], index: 4, kind: output, shape index: {}]  }
   0x1 LB: > { %s352_s16 = sadd.s32 4294967295, %s402_s15   ;;  %p356_p0 = scmp.ge.s32.totalorder %s402_s15, 1  ;;  %s402_s15 = sphi %s429_s15, %s14_s15  }
   0x2   : > { %p174_p1 = scmp.lt.s32.totalorder %s402_s15, 3 }
   0x4   : > { %p175_p2 = pnand %p356_p0, %p174_p1 }
   0x5   : > { %s357_s17 = sshll.u32 (!%p175_p2), %s352_s16, 1 }
   0x6   : > { %178 = sbr.rel (%p175_p2) target bundleno = 333 (0x14d), region = 36  ;;  %p206_p3 = scmp.lt.s32.totalorder (!%p175_p2), %s357_s17, 3 }
   0xb   : > { %s466_s17 = smov (!%p206_p3, %s357_s17), 3  ;;  %v363_v24 = vld [vmem:[%s462_s2] ss:$0 sm:$0xff] }
   0xc   : > { %s437_s18 = sshll.u32 %s466_s17, 2  ;;  %v364_v28 = vld [vmem:[%s463_s3] ss:$0 sm:$0xff] }
   0xd   : > { %s209_s21 = scalar_lea.vmem %s460_s0, %s437_s18  ;;  %s215_s24 = scalar_lea.vmem %s461_s1, %s437_s18 }
   0xe   : > { %v372_v0 = vld [vmem:[%s209_s21] sm:$0xff]   ;;  %s221_s5 = scalar_lea.vmem %s464_s4, %s437_s18 }
   0xf   : > { %v376_v1 = vld [vmem:[%s215_s24] sm:$0xff]   ;;  %v373_v2 = vunpack.c.l.bf16 %v372_v0  ;;  %v374_v4 = vunpack.c.h.bf16 %v372_v0 }
  0x10   : > { %v377_v3 = vunpack.c.l.bf16 %v376_v1  ;;  %v378_v5 = vunpack.c.h.bf16 %v376_v1 }
  0x12   : > { %v231_v6 = vadd.f32 %v377_v3, %v373_v2  ;;  %v232_v7 = vadd.f32 %v378_v5, %v374_v4 }
  0x14   : > { %235 = vadd.xlane.f32.xlu0 %v231_v6 }
  0x18   : > { %237 = vadd.xlane.f32.xlu0 %v232_v7 }
  0x9d   : > { %v236_v8 = vpop.xlane.xlu0 %235 }
  0x9e   : > { %v240_v9 = vmul.f32 0.0078125, %v236_v8 }
  0xa0   : > { %v242_v10 = vsub.f32 %v231_v6, %v240_v9 }
  0xa1   : > { %v238_v11 = vpop.xlane.xlu0 %237 }
  0xa2   : > { %v241_v12 = vmul.f32 0.0078125, %v238_v11  ;;  %v244_v13 = vmul.f32 %v242_v10, %v242_v10 }
  0xa4   : > { %v243_v14 = vsub.f32 %v232_v7, %v241_v12  ;;  %246 = vadd.xlane.f32.xlu1 %v244_v13 }
  0xa6   : > { %v245_v15 = vmul.f32 %v243_v14, %v243_v14 }
  0xa8   : > { %248 = vadd.xlane.f32.xlu1 %v245_v15 }
 0x12d   : > { %v247_v16 = vpop.xlane.xlu1 %246 }
 0x12e   : > { %v250_v17 = vmul.f32 0.0078125, %v247_v16 }
 0x130   : > { %v252_v18 = vadd.f32 1e-12, %v250_v17 }
 0x131   : > { %v249_v19 = vpop.xlane.xlu1 %248 }
 0x132   : > { %392 = vrsqrt.f32 %v252_v18  ;;  %v251_v20 = vmul.f32 0.0078125, %v249_v19 }
 0x134   : > { %v253_v21 = vadd.f32 1e-12, %v251_v20 }
 0x136   : > { %394 = vrsqrt.f32 %v253_v21 }
 0x13f   : > { %v393_v22 = vpop.eup %392 }
 0x140   : > { %v256_v23 = vmul.f32 %v393_v22, %v242_v10 }
 0x142   : > { %v264_v26 = vmul.f32 %v363_v24, %v256_v23 }
 0x143   : > { %v395_v25 = vpop.eup %394 }
 0x144   : > { %v257_v27 = vmul.f32 %v395_v25, %v243_v14  ;;  %v272_v30 = vadd.f32 %v364_v28, %v264_v26 }
 0x146   : > { %v265_v29 = vmul.f32 %v363_v24, %v257_v27 }
 0x148   : > { %v273_v31 = vadd.f32 %v364_v28, %v265_v29 }
 0x14a   : > { %v382_v32 = vpack.c.bf16 %v273_v31, %v272_v30 }
 0x14c   : > { %383 = vst [vmem:[%s221_s5] sm:$0xff] %v382_v32  }
 0x14d PF: > { %s14_s15 = sadd.s32 1, %s402_s15  }
 0x14e   : > { %p11_p4 = scmp.ge.s32.totalorder %s14_s15, 4  }
 0x150   :  { %13 = sbr.rel (!%p11_p4) target bundleno = 1 (0x1), region = 69 }

// kernel: caue_bert_forward.16
= control target key start
LH: loop header
LB: loop body
LE: loop exit
PB: predicated region body
PF: predicated region fallthrough
CT: control target
= control target key end

     0   :  { %s920_s12 = smov 0   ;;  %s922_s13 = smov 0   ;;  %s1035_s0 = inlined_call_operand.vmem [shape: bf16[32,128], index: 0, kind: input, shape index: {}]   ;;  %s1036_s1 = inlined_call_operand.vmem [shape: bf16[128,384], index: 1, kind: input, shape index: {}]   ;;  %s1037_s2 = inlined_call_operand.vmem [shape: f32[1,384], index: 2, kind: input, shape index: {}]   ;;  %s1038_s3 = inlined_call_operand.vmem [shape: bf16[32,384], index: 3, kind: output, shape index: {}]  }
   0x1   :  { %s924_s14 = smov 0  }
   0x2 LB: > { %s32_s15 = sadd.s32 1, %s891_s13  ;;  %p743_p0 = scmp.ge.s32.totalorder %s895_s14, 1  ;;  %s895_s14 = sphi %s924_s14, %s13_s14   ;;  %s891_s13 = sphi %s922_s13, %s1040_s13   ;;  %s887_s12 = sphi %s920_s12, %s1039_s12  }
   0x3   : > { %p34_p1 = scmp.ge.s32.totalorder %s32_s15, 2  ;;  %p193_p2 = scmp.lt.s32.totalorder %s895_s14, 3 }
   0x5   : > { %s1042_s15 = smov (%p34_p1, %s32_s15), 0  ;;  %p194_p3 = pnand %p743_p0, %p193_p2 }
   0x6   : > { %s744_s22 = sshll.u32 (!%p194_p3), %s887_s12, 1 }
   0x7   : > { %197 = sbr.rel (%p194_p3) target bundleno = 250 (0xfa), region = 32  ;;  %p240_p4 = scmp.lt.s32.totalorder (!%p194_p3), %s744_s22, 3 }
   0xc   : > { %v840_v0 = vld [vmem:[%s1036_s1 + $0xac] ss:$12 sps:$4 sm:$0xff]   ;;  %v897_v1 = vmov 0.0   ;;  %v842_v2 = vld [vmem:[%s1036_s1 + $0xb0] ss:$12 sps:$4 sm:$0xff]   ;;  %vm898_vm0 = vmmov 0   ;;  %v569_v27 = vlaneseq }
   0xd   : > { %792 = vmatprep.subr.bf16.mxu1 %v897_v1  ;;  %808 = vmatprep.mubr.msk.bf16.mxu1 %vm898_vm0, %v897_v1  ;;  %v843_v3 = vld [vmem:[%s1036_s1 + $0xa8] ss:$12 sps:$4 sm:$0xff]   ;;  %v899_v5 = vmov 0   ;;  %v846_v6 = vld [vmem:[%s1036_s1 + $0x98] ss:$12 sps:$4 sm:$0xff]   ;;  %s1044_s22 = smov (!%p240_p4, %s744_s22), 3 }
   0xe   : > { %462 = vmatprep.subr.bf16.mxu0 %v840_v0  ;;  %793 = vmatpush3.bf16.msra.mxu1 %v842_v2  ;;  %v844_v4 = vld [vmem:[%s1036_s1 + $0x94] ss:$12 sps:$4 sm:$0xff]   ;;  %v847_v7 = vld [vmem:[%s1036_s1 + $0x90] ss:$12 sps:$4 sm:$0xff]   ;;  %v851_v10 = vld [vmem:[%s1036_s1 + $0x78] ss:$12 sps:$4 sm:$0xff]  }
   0xf   : > { %494 = vmatprep.mubr.bf16.mxu0 %v899_v5  ;;  %463 = vmatpush1.bf16.msra.mxu0 %v843_v3  ;;  %v848_v8 = vld [vmem:[%s1036_s1 + $0x7c] ss:$12 sps:$4 sm:$0xff]   ;;  %v850_v9 = vld [vmem:[%s1036_s1 + $0x80] ss:$12 sps:$4 sm:$0xff]   ;;  %v852_v11 = vld [vmem:[%s1036_s1 + $0x64] ss:$12 sps:$4 sm:$0xff]  }
  0x10   : > { %794 = vmatprep.subr.bf16.mxu1 %v897_v1  ;;  %464 = vmatprep.subr.bf16.mxu0 %v844_v4  ;;  %v854_v12 = vld [vmem:[%s1036_s1 + $0x68] ss:$12 sps:$4 sm:$0xff]   ;;  %v855_v13 = vld [vmem:[%s1036_s1 + $0x60] ss:$12 sps:$4 sm:$0xff]   ;;  %s745_s19 = sshll.u32 %s1044_s22, 2  ;;  %v570_v28 = vshrl.u32 %v569_v27, 7 }
  0x11   : > { %v856_v14 = vld [vmem:[%s1036_s1 + $0x4c] ss:$12 sps:$4 sm:$0xff]   ;;  %v858_v15 = vld [vmem:[%s1036_s1 + $0x50] ss:$12 sps:$4 sm:$0xff]   ;;  %v859_v16 = vld [vmem:[%s1036_s1 + $0x48] ss:$12 sps:$4 sm:$0xff]   ;;  %s246_s29 = scalar_lea.vmem %s1035_s0, %s745_s19 }
  0x12   : > { %795 = vmatpush3.bf16.msra.mxu1 %v846_v6  ;;  %v860_v17 = vld [vmem:[%s1036_s1 + $0x34] ss:$12 sps:$4 sm:$0xff]   ;;  %v862_v18 = vld [vmem:[%s1036_s1 + $0x38] ss:$12 sps:$4 sm:$0xff]   ;;  %v863_v19 = vld [vmem:[%s1036_s1 + $0x30] ss:$12 sps:$4 sm:$0xff]  }
  0x13   : > { %465 = vmatpush1.bf16.msra.mxu0 %v847_v7  ;;  %796 = vmatprep.subr.bf16.mxu1 %v897_v1  ;;  %v864_v20 = vld [vmem:[%s1036_s1 + $0x1c] ss:$12 sps:$4 sm:$0xff]   ;;  %v866_v21 = vld [vmem:[%s1036_s1 + $0x20] ss:$12 sps:$4 sm:$0xff]   ;;  %v867_v22 = vld [vmem:[%s1036_s1 + $0x18] ss:$12 sps:$4 sm:$0xff]  }
  0x14   : > { %466 = vmatprep.subr.bf16.mxu0 %v848_v8  ;;  %v868_v23 = vld [vmem:[%s1036_s1 + $0x4] ss:$12 sps:$4 sm:$0xff]   ;;  %v870_v24 = vld [vmem:[%s1036_s1 + $0x8] ss:$12 sps:$4 sm:$0xff]   ;;  %v871_v25 = vld [vmem:[%s1036_s1] ss:$12 sps:$4 sm:$0xff]  }
  0x15   : > { %v872_v26 = vld [vmem:[%s246_s29] sm:$0xff]   ;;  %v579_v29 = vsub.s32 2, %v570_v28  ;;  %v571_v31 = vsub.s32 0, %v570_v28  ;;  %v575_v32 = vsub.s32 1, %v570_v28  ;;  %s812_s25 = smul.u32 12, %s1044_s22 }
  0x16   : > { %797 = vmatpush3.bf16.msra.mxu1 %v850_v9  ;;  %v567_v30 = vld [vmem:[%s1037_s2] sm:$0x7] }
  0x17   : > { %467 = vmatpush1.bf16.msra.mxu0 %v851_v10  ;;  %798 = vmatprep.subr.bf16.mxu1 %v897_v1  ;;  %v580_v33 = vrot.slane %v567_v30, %v579_v29  ;;  %v572_v35 = vrot.slane %v567_v30, %v571_v31  ;;  %v576_v36 = vrot.slane %v567_v30, %v575_v32  ;;  %s274_s28 = scalar_lea.vmem %s1038_s3, %s812_s25 }
  0x18   : > { %468 = vmatprep.subr.bf16.mxu0 %v852_v11 }
  0x1a   : > { %799 = vmatpush3.bf16.msra.mxu1 %v854_v12 }
  0x1b   : > { %469 = vmatpush1.bf16.msra.mxu0 %v855_v13  ;;  %800 = vmatprep.subr.bf16.mxu1 %v897_v1 }
  0x1c   : > { %470 = vmatprep.subr.bf16.mxu0 %v856_v14 }
  0x1e   : > { %801 = vmatpush3.bf16.msra.mxu1 %v858_v15 }
  0x1f   : > { %471 = vmatpush1.bf16.msra.mxu0 %v859_v16  ;;  %802 = vmatprep.subr.bf16.mxu1 %v897_v1 }
  0x20   : > { %472 = vmatprep.subr.bf16.mxu0 %v860_v17 }
  0x22   : > { %803 = vmatpush3.bf16.msra.mxu1 %v862_v18 }
  0x23   : > { %473 = vmatpush1.bf16.msra.mxu0 %v863_v19  ;;  %804 = vmatprep.subr.bf16.mxu1 %v897_v1 }
  0x24   : > { %474 = vmatprep.subr.bf16.mxu0 %v864_v20 }
  0x26   : > { %805 = vmatpush3.bf16.msra.mxu1 %v866_v21 }
  0x27   : > { %475 = vmatpush1.bf16.msra.mxu0 %v867_v22  ;;  %806 = vmatprep.subr.bf16.mxu1 %v897_v1 }
  0x28   : > { %476 = vmatprep.subr.bf16.mxu0 %v868_v23 }
  0x2a   : > { %807 = vmatpush3.bf16.msra.mxu1 %v870_v24 }
  0x2b   : > { %477 = vmatpush1.bf16.msra.mxu0 %v871_v25 }
  0x2d   : > { %809 = vmatmul.mubr.bf16.vlgmr.msra.gmra.mxu1 %v872_v26 }
  0x2e   : > { %495 = vmatmul.mubr.bf16.vlgmr.msra.gmra.mxu0 %v872_v26 }
  0xed   : > { %v539_v34 = vpop.f32.mrf.mxu1 }
  0xee   : > { %v586_v37 = vadd.f32 %v580_v33, %v539_v34  ;;  %v496_v38 = vpop.f32.mrf.mxu0 }
  0xef   : > { %v810_v39 = vpop.f32.mrf.mxu1  ;;  %v584_v42 = vadd.f32 %v572_v35, %v496_v38 }
  0xf0   : > { %v780_v40 = vpack.c.bf16 %v586_v37, %v586_v37  ;;  %v498_v41 = vpop.f32.mrf.mxu0 }
  0xf1   : > { %v585_v43 = vadd.f32 %v576_v36, %v498_v41  ;;  %v542_v44 = vpop.f32.mrf.mxu1 }
  0xf2   : > { %611 = vst [vmem:[%s274_s28 + $0x8] sm:$0xf] %v780_v40  ;;  %v589_v45 = vadd.f32 %v580_v33, %v542_v44  ;;  %v500_v46 = vpop.f32.mrf.mxu0 }
  0xf3   : > { %v779_v47 = vpack.c.bf16 %v585_v43, %v584_v42  ;;  %v811_v48 = vpop.f32.mrf.mxu1  ;;  %v587_v51 = vadd.f32 %v572_v35, %v500_v46 }
  0xf4   : > { %v782_v49 = vpack.c.bf16 %v589_v45, %v589_v45  ;;  %v502_v50 = vpop.f32.mrf.mxu0 }
  0xf5   : > { %610 = vst [vmem:[%s274_s28] sm:$0xff] %v779_v47  ;;  %v588_v52 = vadd.f32 %v576_v36, %v502_v50 }
  0xf6   : > { %613 = vst [vmem:[%s274_s28 + $0x14] sm:$0xf] %v782_v49 }
  0xf7   : > { %v781_v53 = vpack.c.bf16 %v588_v52, %v587_v51 }
  0xf9   : > { %612 = vst [vmem:[%s274_s28 + $0xc] sm:$0xff] %v781_v53 }
  0xfa PF: > { %s13_s14 = sadd.s32 1, %s895_s14   ;;  %s1039_s12 = smov %s891_s13 }
  0xfb   : > { %p10_p5 = scmp.ge.s32.totalorder %s13_s14, 4   ;;  %s1040_s13 = smov %s1042_s15 }
  0xfd   :  { %12 = sbr.rel (!%p10_p5) target bundleno = 2 (0x2), region = 76 }

// kernel: caue_bert_forward.17
= control target key start
LH: loop header
LB: loop body
LE: loop exit
PB: predicated region body
PF: predicated region fallthrough
CT: control target
= control target key end

     0   :  { %s1569_s18 = smov 0   ;;  %s1571_s19 = smov 0   ;;  %s1766_s0 = inlined_call_operand.vmem [shape: bf16[4,8,384], index: 0, kind: input, shape index: {}, may-alias: {0,1,2}]   ;;  %s1767_s1 = inlined_call_operand.vmem [shape: bf16[4,8,384], index: 1, kind: input, shape index: {}, may-alias: {0,1,2}]   ;;  %s1768_s2 = inlined_call_operand.vmem [shape: bf16[4,8,384], index: 2, kind: input, shape index: {}, may-alias: {0,1,2}]   ;;  %s1769_s3 = inlined_call_operand.vmem [shape: bf16[128,128], index: 3, kind: input, shape index: {}]   ;;  %s1770_s4 = inlined_call_operand.vmem [shape: f32[1,128], index: 4, kind: input, shape index: {}]   ;;  %s1771_s5 = inlined_call_operand.vmem [shape: bf16[4,8,128], index: 5, kind: output, shape index: {}]  }
   0x1   :  { %s1573_s20 = smov 0   ;;  %s1575_s21 = smov 0  }
   0x2   :  { %s1577_s22 = smov 0  }
   0x3 LB: > { %s27_s23 = sadd.s32 1, %s1530_s21  ;;  %p43_p1 = scmp.ne.s32.totalorder %s1522_s19, %s1518_s18  ;;  %s1534_s22 = sphi %s1577_s22, %s15_s22   ;;  %s1530_s21 = sphi %s1575_s21, %s1776_s21   ;;  %s1526_s20 = sphi %s1573_s20, %s1775_s20   ;;  %s1522_s19 = sphi %s1571_s19, %s1774_s19   ;;  %s1518_s18 = sphi %s1569_s18, %s1773_s18  }
   0x4   : > { %p29_p0 = scmp.ge.s32.totalorder %s27_s23, 2  ;;  %p44_p2 = scmp.eq.s32.totalorder %s1534_s22, 0 }
   0x5   : > { %s36_s26 = sadd.s32 1, %s1522_s19  ;;  %p1269_p5 = scmp.ge.s32.totalorder %s1534_s22, 2 }
   0x6   : > { %s1778_s23 = smov (%p29_p0, %s27_s23), 0  ;;  %p1600_p3 = por %p44_p2, %p43_p1 }
   0x7   : > { %s31_s25 = ssub.s32 %s1530_s21, %s1778_s23  ;;  %214 = sbr.rel (%p1269_p5) target bundleno = 30 (0x1e), region = 24 }
   0x8   : > { %p34_p4 = scmp.eq.s32.totalorder %s31_s25, 0 }
   0xa   : > { %s1608_s27 = scalar_select %p34_p4, %s1522_s19, %s36_s26  }
   0xc   : > { %217 = sbr.rel (!%p1600_p3) target bundleno = 18 (0x12), region = 28  ;;  %s219_s28 = sand.u32 (%p1600_p3), 1, %s1522_s19  }
   0xd   : > { %s1422_s29 = smul.u32 (%p1600_p3), 24, %s1530_s21  ;;  %s1270_s30 = sshll.u32 (%p1600_p3), %s219_s28, 3 }
   0xe   : > { %s221_s9 = scalar_lea.vmem (%p1600_p3), [#allocation3], %s1270_s30 }
   0xf   : > { %s226_s8 = scalar_lea.vmem (%p1600_p3), %s1766_s0, %s1422_s29 }
  0x10   : > { %v243_v0 = vld [vmem:[%s226_s8] sm:$0xf] (%p1600_p3)  ;;  %v245_v1 = vld [vmem:[%s226_s8 + $0xc] sm:$0xf] (%p1600_p3) }
  0x11   : > { %244 = vst [vmem:[%s221_s9] sm:$0xf] %v243_v0  ;;  %246 = vst [vmem:[%s221_s9 + $0x4] sm:$0xf] %v245_v1 }
  0x12 PF: > { %274 = sbr.rel (!%p1600_p3) target bundleno = 24 (0x18), region = 69  ;;  %s276_s10 = sand.u32 (%p1600_p3), 1, %s1522_s19  }
  0x13   : > { %s1275_s11 = smul.u32 (%p1600_p3), 24, %s1530_s21  ;;  %s1274_s12 = sshll.u32 (%p1600_p3), %s276_s10, 3 }
  0x14   : > { %s278_s16 = scalar_lea.vmem (%p1600_p3), [#allocation4], %s1274_s12 }
  0x15   : > { %s1170_s15 = scalar_lea.vmem (%p1600_p3), %s1767_s1, %s1275_s11 }
  0x16   : > { %v1276_v2 = vld [vmem:[%s1170_s15 + $0x4] sm:$0xf] (%p1600_p3)  ;;  %v1277_v3 = vld [vmem:[%s1170_s15 + $0x10] sm:$0xf] (%p1600_p3) }
  0x17   : > { %302 = vst [vmem:[%s278_s16] sm:$0xf] %v1276_v2  ;;  %304 = vst [vmem:[%s278_s16 + $0x4] sm:$0xf] %v1277_v3 }
  0x18 PF: > { %332 = sbr.rel (!%p1600_p3) target bundleno = 30 (0x1e), region = 110  ;;  %s334_s17 = sand.u32 (%p1600_p3), 1, %s1522_s19  }
  0x19   : > { %s1279_s25 = smul.u32 (%p1600_p3), 24, %s1530_s21  ;;  %s1278_s26 = sshll.u32 (%p1600_p3), %s334_s17, 3 }
  0x1a   : > { %s336_s6 = scalar_lea.vmem (%p1600_p3), [#allocation5], %s1278_s26 }
  0x1b   : > { %s1177_s30 = scalar_lea.vmem (%p1600_p3), %s1768_s2, %s1279_s25 }
  0x1c   : > { %v1280_v4 = vld [vmem:[%s1177_s30 + $0x8] sm:$0xf] (%p1600_p3)  ;;  %v1281_v5 = vld [vmem:[%s1177_s30 + $0x14] sm:$0xf] (%p1600_p3) }
  0x1d   : > { %360 = vst [vmem:[%s336_s6] sm:$0xf] %v1280_v4  ;;  %362 = vst [vmem:[%s336_s6 + $0x4] sm:$0xf] %v1281_v5 }
  0x1e PF: > { %p1282_p6 = scmp.ge.s32.totalorder %s1534_s22, 1  ;;  %p389_p7 = scmp.lt.s32.totalorder %s1534_s22, 3 }
  0x20   : > { %p390_p8 = pnand %p1282_p6, %p389_p7 }
  0x21   : > { %s396_s24 = sand.u32 (!%p390_p8), 1, %s1518_s18   ;;  %s1538_s9 = smov (!%p390_p8), 64  }
  0x22   : > { %393 = sbr.rel (%p390_p8) target bundleno = 1490 (0x5d2), region = 151  ;;  %s1636_s7 = sshll.u32 (!%p390_p8), %s396_s24, 3 }
  0x23   : > { %s1644_s8 = scalar_lea.vmem (!%p390_p8), [#allocation4], %s1636_s7  ;;  %s398_s18 = scalar_lea.vmem (!%p390_p8), [#allocation3], %s1636_s7 }
  0x24   : > { %s1667_s10 = scalar_lea.vmem (!%p390_p8), [#allocation5], %s1636_s7 }
  0x27   : > { %v1536_v6 = vmov 0.0   ;;  %vm480_vm0 = vcmask 523264   ;;  %vm1537_vm1 = vmmov 0   ;;  %v476_v7 = vld [vmem:[%s1644_s8] sm:$0xf]  ;;  %vm575_vm2 = vcmask 64512  }
  0x28   : > { %1350 = vmatprep.subr.bf16.mxu1 %v1536_v6  ;;  %1352 = vmatprep.mubr.msk.bf16.mxu1 %vm1537_vm1, %v1536_v6  ;;  %v477_v8 = vld [vmem:[%s1644_s8 + $0x4] sm:$0xf]  ;;  %v485_v9 = vsel %vm480_vm0, %v476_v7, 0  ;;  %v1466_v11 = vld [vmem:[%s1644_s8] ss:$0 sps:$4 sm:$0xff]   ;;  %vm603_vm3 = vcmask 1043456  }
  0x29   : > { %1362 = vmatprep.subr.bf16.mxu0 %v1536_v6  ;;  %1364 = vmatprep.mubr.msk.bf16.mxu0 %vm1537_vm1, %v1536_v6  ;;  %v531_v10 = vsel %vm480_vm0, %v477_v8, 0  ;;  %v1467_v12 = vld [vmem:[%s398_s18] ss:$0 sps:$4 sm:$0xff]   ;;  %v1468_v14 = vld [vmem:[%s398_s18 + $0x4] ss:$0 sps:$4 sm:$0xff]   ;;  %v1470_v57 = vld [vmem:[%s1769_s3 + $0x18] sm:$0xff]  }
  0x2a   : > { %1351 = vmatpush3.bf16.xpose.msra.mxu1 %v485_v9  ;;  %v474_v13 = vld [vmem:[%s398_s18] sm:$0xf]  ;;  %796 = vrot.lane.b32.xlu1 %v1466_v11, %s1538_s9  ;;  %v475_v15 = vld [vmem:[%s398_s18 + $0x4] sm:$0xf]  ;;  %v1469_v37 = vld [vmem:[%s1644_s8 + $0x4] ss:$0 sps:$4 sm:$0xff]  }
  0x2b   : > { %1356 = vmatprep.subr.bf16.mxu1 %v1536_v6  ;;  %v479_v34 = vld [vmem:[%s1667_s10 + $0x4] sm:$0xf]  ;;  %v478_v44 = vld [vmem:[%s1667_s10] sm:$0xf]  ;;  %v1471_v58 = vld [vmem:[%s1769_s3 + $0x10] sm:$0xff]   ;;  %s1286_s18 = sshll.u32 %s1526_s20, 1 }
  0x2c   : > { %v651_v35 = vsel %vm603_vm3, %v479_v34, 0  ;;  %v605_v45 = vsel %vm603_vm3, %v478_v44, 0  ;;  %v1472_v59 = vld [vmem:[%s1769_s3 + $0x8] sm:$0xff]   ;;  %v1473_v60 = vld [vmem:[%s1769_s3] sm:$0xff]   ;;  %p462_p9 = scmp.lt.s32.totalorder %s1286_s18, 3 }
  0x2d   : > { %1363 = vmatpush3.bf16.msra.mxu0 %v605_v45 }
  0x2e   : > { %791 = vrot.lane.b32.xlu1 %v1467_v12, %s1538_s9  ;;  %1374 = vmatprep.subr.bf16.mxu0 %v1536_v6  ;;  %s1780_s18 = smov (!%p462_p9, %s1286_s18), 3 }
  0x2f   : > { %s1287_s11 = sshll.u32 %s1780_s18, 2 }
  0x30   : > { %s465_s14 = scalar_lea.vmem %s1771_s5, %s1287_s11 }
  0x31   : > { %1353 = vmatmul.mubr.msk.bf16.vlgmr.msra.gmra.mxu1 %vm480_vm0, %v474_v13 }
  0x32   : > { %1357 = vmatpush3.bf16.xpose.msra.mxu1 %v531_v10  ;;  %1358 = vmatprep.mubr.msk.bf16.mxu1 %vm1537_vm1, %v1536_v6 }
  0x33   : > { %1368 = vmatprep.subr.bf16.mxu1 %v1536_v6  ;;  %847 = vrot.lane.b32.xlu1 %v1468_v14, %s1538_s9  ;;  %v1474_v14 = vld [vmem:[%s1667_s10] ss:$0 sps:$4 sm:$0xff]  }
  0x39   : > { %1359 = vmatmul.mubr.msk.bf16.vlgmr.msra.gmra.mxu1 %vm480_vm0, %v475_v15 }
  0x3a   : > { %1370 = vmatprep.mubr.msk.bf16.mxu1 %vm1537_vm1, %v1536_v6  ;;  %1369 = vmatpush3.bf16.msra.mxu1 %v651_v35 }
  0x3b   : > { %1386 = vmatprep.subr.bf16.mxu1 %v1536_v6 }
  0x9c   : > { %v797_v33 = vpop.permute.xlu1 %796 }
  0x9d   : > { %v802_v49 = vsel %vm480_vm0, %v797_v33, 0 }
  0xa0   : > { %v792_v36 = vpop.permute.xlu1 %791 }
  0xa5   : > { %v848_v38 = vpop.permute.xlu1 %847 }
  0xf1   : > { %v521_v16 = vpop.f32.mrf.mxu1 }
  0xf2   : > { %v573_v17 = vmul.f32 0.125, %v521_v16 }
  0xf3   : > { %v1354_v18 = vpop.f32.mrf.mxu1 }
  0xf4   : > { %v576_v19 = vsel %vm575_vm2, %v573_v17, -inf }
  0xf5   : > { %577 = vmax.xlane.f32.xlu1 %v576_v19  ;;  %v524_v20 = vpop.f32.mrf.mxu1 }
  0xf7   : > { %v1355_v21 = vpop.f32.mrf.mxu1 }
  0xf9   : > { %v567_v22 = vpop.f32.mrf.mxu1 }
  0xfa   : > { %v574_v23 = vmul.f32 0.125, %v567_v22 }
  0xfb   : > { %v1360_v24 = vpop.f32.mrf.mxu1 }
  0xfc   : > { %v579_v25 = vsel %vm575_vm2, %v574_v23, -inf }
  0xfd   : > { %580 = vmax.xlane.f32.xlu0 %v579_v25  ;;  %v570_v26 = vpop.f32.mrf.mxu1 }
  0xff   : > { %v1361_v27 = vpop.f32.mrf.mxu1 }
 0x17e   : > { %v578_v39 = vpop.xlane.xlu1 %577 }
 0x17f   : > { %v582_v40 = vsub.f32 %v573_v17, %v578_v39 }
 0x181   : > { %v584_v41 = vmul.f32 1.442695, %v582_v40 }
 0x186   : > { %v581_v28 = vpop.xlane.xlu0 %580 }
 0x187   : > { %v583_v29 = vsub.f32 %v574_v23, %v581_v28 }
 0x189   : > { %v586_v30 = vmul.f32 1.442695, %v583_v29 }
 0x18b   : > { %1480 = vpow2.f32 %v586_v30 }
 0x18c   : > { %1482 = vpow2.f32 %v584_v41 }
 0x198   : > { %v1481_v31 = vpop.eup %1480 }
 0x199   : > { %v591_v32 = vsel %vm575_vm2, %v1481_v31, 0.0  ;;  %v1483_v42 = vpop.eup %1482 }
 0x19a   : > { %592 = vadd.xlane.f32.xlu0 %v591_v32  ;;  %v588_v43 = vsel %vm575_vm2, %v1483_v42, 0.0  ;;  %v1475_v32 = vld [vmem:[%s1667_s10 + $0x4] ss:$0 sps:$4 sm:$0xff]  }
 0x1b0   : > { %852 = vrot.lane.b32.xlu0 %v1469_v37, %s1538_s9 }
 0x1cf   : > { %589 = vadd.xlane.f32.xlu0 %v588_v43  ;;  %v1476_v43 = vld [vmem:[%s1769_s3 + $0x38] sm:$0xff]  }
 0x1e5   : > { %929 = vrot.lane.b32.xlu0 %v1474_v14, %s1538_s9 }
 0x223   : > { %v593_v46 = vpop.xlane.xlu0 %592 }
 0x224   : > { %1484 = vrcp.f32 %v593_v46 }
 0x227   : > { %v853_v51 = vpop.permute.xlu0 %852 }
 0x228   : > { %v858_v52 = vsel %vm480_vm0, %v853_v51, 0 }
 0x231   : > { %v1485_v47 = vpop.eup %1484 }
 0x232   : > { %v597_v48 = vmul.f32 %v1485_v47, %v1481_v31 }
 0x234   : > { %v599_v50 = vpack.c.bf16 %v597_v48, %v597_v48  ;;  %v1477_v48 = vld [vmem:[%s1769_s3 + $0x30] sm:$0xff]  }
 0x236   : > { %1371 = vmatmul.mubr.msk.bf16.vlgmr.msra.gmra.mxu1 %vm575_vm2, %v599_v50  ;;  %v1479_v50 = vld [vmem:[%s1769_s3 + $0x20] sm:$0xff]  }
 0x237   : > { %1387 = vmatpush3.bf16.xpose.msra.mxu1 %v802_v49  ;;  %1388 = vmatprep.mubr.msk.bf16.mxu1 %vm1537_vm1, %v1536_v6  ;;  %v1478_v49 = vld [vmem:[%s1769_s3 + $0x28] sm:$0xff]  }
 0x238   : > { %1392 = vmatprep.subr.bf16.mxu1 %v1536_v6 }
 0x23e   : > { %1389 = vmatmul.mubr.msk.bf16.vlgmr.msra.gmra.mxu1 %vm480_vm0, %v792_v36 }
 0x23f   : > { %1393 = vmatpush3.bf16.xpose.msra.mxu1 %v858_v52  ;;  %1394 = vmatprep.mubr.msk.bf16.mxu1 %vm1537_vm1, %v1536_v6 }
 0x240   : > { %1404 = vmatprep.subr.bf16.mxu1 %v1536_v6 }
 0x246   : > { %1395 = vmatmul.mubr.msk.bf16.vlgmr.msra.gmra.mxu1 %vm480_vm0, %v848_v38 }
 0x247   : > { %1406 = vmatprep.mubr.msk.bf16.mxu1 %vm1537_vm1, %v1536_v6 }
 0x258   : > { %v590_v53 = vpop.xlane.xlu0 %589 }
 0x259   : > { %1486 = vrcp.f32 %v590_v53 }
 0x25c   : > { %v930_v30 = vpop.permute.xlu0 %929 }
 0x25d   : > { %v935_v31 = vsel %vm603_vm3, %v930_v30, 0 }
 0x266   : > { %v1487_v54 = vpop.eup %1486 }
 0x267   : > { %v596_v55 = vmul.f32 %v1487_v54, %v1483_v42 }
 0x269   : > { %v598_v56 = vpack.c.bf16 %v596_v55, %v596_v55 }
 0x26b   : > { %1365 = vmatmul.mubr.msk.bf16.vlgmr.msra.gmra.mxu0 %vm575_vm2, %v598_v56 }
 0x26c   : > { %1382 = vmatprep.mubr.msk.bf16.mxu0 %vm1537_vm1, %v1536_v6  ;;  %1375 = vmatpush3.bf16.msra.mxu0 %v1470_v57 }
 0x26d   : > { %1376 = vmatprep.subr.bf16.mxu0 %v1536_v6 }
 0x270   : > { %1377 = vmatpush3.bf16.msra.mxu0 %v1471_v58 }
 0x271   : > { %1378 = vmatprep.subr.bf16.mxu0 %v1536_v6 }
 0x274   : > { %1379 = vmatpush3.bf16.msra.mxu0 %v1472_v59 }
 0x275   : > { %1380 = vmatprep.subr.bf16.mxu0 %v1536_v6 }
 0x278   : > { %1381 = vmatpush3.bf16.msra.mxu0 %v1473_v60 }
 0x279   : > { %1398 = vmatprep.subr.bf16.mxu0 %v1536_v6 }
 0x2f6   : > { %v687_v61 = vpop.f32.mrf.mxu1 }
 0x2f8   : > { %v1372_v62 = vpop.f32.mrf.mxu1 }
 0x2f9   : > { %v1314_v62 = vld [vmem:[%s1770_s4] ss:$0 sm:$0xff] }
 0x2fa   : > { %v690_v63 = vpop.f32.mrf.mxu1 }
 0x2fc   : > { %v1373_v0 = vpop.f32.mrf.mxu1 }
 0x2fe   : > { %v838_v1 = vpop.f32.mrf.mxu1 }
 0x2ff   : > { %v900_v2 = vmul.f32 0.125, %v838_v1 }
 0x300   : > { %v1390_v3 = vpop.f32.mrf.mxu1 }
 0x301   : > { %v902_v4 = vsel %vm575_vm2, %v900_v2, -inf }
 0x302   : > { %903 = vmax.xlane.f32.xlu1 %v902_v4  ;;  %v841_v5 = vpop.f32.mrf.mxu1 }
 0x304   : > { %v1391_v7 = vpop.f32.mrf.mxu1 }
 0x306   : > { %v894_v8 = vpop.f32.mrf.mxu1 }
 0x307   : > { %v901_v9 = vmul.f32 0.125, %v894_v8 }
 0x308   : > { %v1396_v10 = vpop.f32.mrf.mxu1 }
 0x309   : > { %v905_v11 = vsel %vm575_vm2, %v901_v9, -inf }
 0x30a   : > { %906 = vmax.xlane.f32.xlu1 %v905_v11  ;;  %v897_v12 = vpop.f32.mrf.mxu1 }
 0x30c   : > { %v1397_v13 = vpop.f32.mrf.mxu1 }
 0x32b   : > { %v641_v15 = vpop.f32.mrf.mxu0 }
 0x32c   : > { %v1317_v16 = vpack.c.bf16 %v687_v61, %v641_v15 }
 0x32d   : > { %v1366_v17 = vpop.f32.mrf.mxu0 }
 0x32e   : > { %1383 = vmatmul.mubr.msk.bf16.vlgmr.msra.gmra.mxu0 %vm480_vm0, %v1317_v16 }
 0x32f   : > { %v644_v18 = vpop.f32.mrf.mxu0  ;;  %1400 = vmatprep.mubr.msk.bf16.mxu0 %vm1537_vm1, %v1536_v6  ;;  %1399 = vmatpush3.bf16.msra.mxu0 %v935_v31 }
 0x330   : > { %1410 = vmatprep.subr.bf16.mxu0 %v1536_v6 }
 0x331   : > { %v1367_v19 = vpop.f32.mrf.mxu0 }
 0x38b   : > { %v904_v20 = vpop.xlane.xlu1 %903 }
 0x38c   : > { %v908_v21 = vsub.f32 %v900_v2, %v904_v20 }
 0x38e   : > { %v910_v22 = vmul.f32 1.442695, %v908_v21 }
 0x390   : > { %1488 = vpow2.f32 %v910_v22 }
 0x393   : > { %v907_v23 = vpop.xlane.xlu1 %906 }
 0x394   : > { %v909_v24 = vsub.f32 %v901_v9, %v907_v23 }
 0x396   : > { %v912_v25 = vmul.f32 1.442695, %v909_v24 }
 0x398   : > { %1490 = vpow2.f32 %v912_v25 }
 0x39d   : > { %v1489_v26 = vpop.eup %1488 }
 0x39e   : > { %v914_v27 = vsel %vm575_vm2, %v1489_v26, 0.0 }
 0x39f   : > { %915 = vadd.xlane.f32.xlu1 %v914_v27 }
 0x3a5   : > { %v1491_v28 = vpop.eup %1490 }
 0x3a6   : > { %v917_v29 = vsel %vm575_vm2, %v1491_v28, 0.0 }
 0x3a7   : > { %918 = vadd.xlane.f32.xlu1 %v917_v29 }
 0x3b8   : > { %980 = vrot.lane.b32.xlu1 %v1475_v32, %s1538_s9 }
 0x3ee   : > { %v771_v33 = vpop.f32.mrf.mxu0 }
 0x3f0   : > { %v1384_v34 = vpop.f32.mrf.mxu0 }
 0x3f2   : > { %v774_v35 = vpop.f32.mrf.mxu0 }
 0x3f4   : > { %v1385_v36 = vpop.f32.mrf.mxu0 }
 0x428   : > { %v916_v37 = vpop.xlane.xlu1 %915 }
 0x429   : > { %1492 = vrcp.f32 %v916_v37 }
 0x430   : > { %v919_v38 = vpop.xlane.xlu1 %918 }
 0x431   : > { %1494 = vrcp.f32 %v919_v38 }
 0x434   : > { %v981_v39 = vpop.permute.xlu1 %980 }
 0x435   : > { %v986_v40 = vsel %vm603_vm3, %v981_v39, 0 }
 0x436   : > { %v1493_v41 = vpop.eup %1492  ;;  %1405 = vmatpush3.bf16.msra.mxu1 %v986_v40 }
 0x437   : > { %v922_v42 = vmul.f32 %v1493_v41, %v1489_v26 }
 0x439   : > { %v924_v44 = vpack.c.bf16 %v922_v42, %v922_v42 }
 0x43b   : > { %1401 = vmatmul.mubr.msk.bf16.vlgmr.msra.gmra.mxu0 %vm575_vm2, %v924_v44 }
 0x43c   : > { %1411 = vmatpush3.bf16.msra.mxu0 %v1476_v43  ;;  %1418 = vmatprep.mubr.msk.bf16.mxu0 %vm1537_vm1, %v1536_v6 }
 0x43d   : > { %1412 = vmatprep.subr.bf16.mxu0 %v1536_v6 }
 0x43e   : > { %v1495_v45 = vpop.eup %1494 }
 0x43f   : > { %v923_v46 = vmul.f32 %v1495_v45, %v1491_v28 }
 0x440   : > { %1413 = vmatpush3.bf16.msra.mxu0 %v1477_v48 }
 0x441   : > { %v925_v47 = vpack.c.bf16 %v923_v46, %v923_v46  ;;  %1414 = vmatprep.subr.bf16.mxu0 %v1536_v6 }
 0x443   : > { %1407 = vmatmul.mubr.msk.bf16.vlgmr.msra.gmra.mxu1 %vm575_vm2, %v925_v47 }
 0x444   : > { %1415 = vmatpush3.bf16.msra.mxu0 %v1478_v49 }
 0x445   : > { %1416 = vmatprep.subr.bf16.mxu0 %v1536_v6 }
 0x448   : > { %1417 = vmatpush3.bf16.msra.mxu0 %v1479_v50 }
 0x4fb   : > { %v971_v51 = vpop.f32.mrf.mxu0 }
 0x4fd   : > { %v1402_v52 = vpop.f32.mrf.mxu0 }
 0x4ff   : > { %v974_v53 = vpop.f32.mrf.mxu0 }
 0x501   : > { %v1403_v54 = vpop.f32.mrf.mxu0 }
 0x503   : > { %v1022_v55 = vpop.f32.mrf.mxu1 }
 0x504   : > { %v1318_v56 = vpack.c.bf16 %v1022_v55, %v971_v51 }
 0x505   : > { %v1408_v57 = vpop.f32.mrf.mxu1 }
 0x506   : > { %1419 = vmatmul.mubr.msk.bf16.vlgmr.msra.gmra.mxu0 %vm480_vm0, %v1318_v56 }
 0x507   : > { %v1025_v58 = vpop.f32.mrf.mxu1 }
 0x509   : > { %v1409_v59 = vpop.f32.mrf.mxu1 }
 0x5c6   : > { %v1106_v60 = vpop.f32.mrf.mxu0 }
 0x5c7   : > { %v1113_v61 = vadd.f32 %v1106_v60, %v771_v33 }
 0x5c8   : > { %v1420_v6 = vpop.f32.mrf.mxu0 }
 0x5c9   : > { %v1129_v2 = vadd.f32 %v1314_v62, %v1113_v61 }
 0x5ca   : > { %v1109_v63 = vpop.f32.mrf.mxu0 }
 0x5cb   : > { %v1114_v0 = vadd.f32 %v1109_v63, %v774_v35 }
 0x5cc   : > { %v1421_v1 = vpop.f32.mrf.mxu0 }
 0x5cd   : > { %v1130_v3 = vadd.f32 %v1314_v62, %v1114_v0 }
 0x5cf   : > { %v1322_v4 = vpack.c.bf16 %v1130_v3, %v1129_v2 }
 0x5d1   : > { %1323 = vst [vmem:[%s465_s14] sm:$0xff] %v1322_v4  }
 0x5d2 PF: > { %s15_s22 = sadd.s32 1, %s1534_s22   ;;  %s1773_s18 = smov %s1522_s19 }
 0x5d3   : > { %p12_p10 = scmp.ge.s32.totalorder %s15_s22, 4   ;;  %s1774_s19 = smov %s1608_s27 }
 0x5d4   : > { %s1775_s20 = smov %s1530_s21  ;;  %s1776_s21 = smov %s1778_s23 }
 0x5d5   :  { %14 = sbr.rel (!%p12_p10) target bundleno = 3 (0x3), region = 225 }

// kernel: caue_bert_forward.20
= control target key start
LH: loop header
LB: loop body
LE: loop exit
PB: predicated region body
PF: predicated region fallthrough
CT: control target
= control target key end

     0   :  { %s751_s12 = smov 0   ;;  %s753_s13 = smov 0   ;;  %s839_s0 = inlined_call_operand.vmem [shape: bf16[32,256], index: 0, kind: input, shape index: {}]   ;;  %s840_s1 = inlined_call_operand.vmem [shape: bf16[256,128], index: 1, kind: input, shape index: {}]   ;;  %s841_s2 = inlined_call_operand.vmem [shape: f32[1,128], index: 2, kind: input, shape index: {}]   ;;  %s842_s3 = inlined_call_operand.vmem [shape: bf16[32,128], index: 3, kind: output, shape index: {}]  }
   0x1   :  { %s755_s14 = smov 0  }
   0x2 LB: > { %s32_s15 = sadd.s32 1, %s725_s13  ;;  %p605_p0 = scmp.ge.s32.totalorder %s729_s14, 1  ;;  %s729_s14 = sphi %s755_s14, %s13_s14   ;;  %s725_s13 = sphi %s753_s13, %s844_s13   ;;  %s721_s12 = sphi %s751_s12, %s843_s12  }
   0x3   : > { %p34_p1 = scmp.ge.s32.totalorder %s32_s15, 2  ;;  %p191_p2 = scmp.lt.s32.totalorder %s729_s14, 3 }
   0x5   : > { %s846_s15 = smov (%p34_p1, %s32_s15), 0  ;;  %p192_p3 = pnand %p605_p0, %p191_p2 }
   0x6   : > { %s606_s18 = sshll.u32 (!%p192_p3), %s721_s12, 1 }
   0x7   : > { %195 = sbr.rel (%p192_p3) target bundleno = 251 (0xfb), region = 32  ;;  %p236_p4 = scmp.lt.s32.totalorder (!%p192_p3), %s606_s18, 3 }
   0xc   : > { %v688_v0 = vld [vmem:[%s840_s1 + $0x78] sm:$0xff]   ;;  %v690_v2 = vld [vmem:[%s840_s1 + $0x70] sm:$0xff]   ;;  %v692_v4 = vld [vmem:[%s840_s1 + $0x68] sm:$0xff]   ;;  %s848_s18 = smov (!%p236_p4, %s606_s18), 3 }
   0xd   : > { %v689_v1 = vld [vmem:[%s840_s1 + $0x38] sm:$0xff]   ;;  %642 = vmatprep.subr.bf16.mxu0 %v688_v0  ;;  %v691_v3 = vld [vmem:[%s840_s1 + $0x30] sm:$0xff]   ;;  %v693_v5 = vld [vmem:[%s840_s1 + $0x28] sm:$0xff]   ;;  %s634_s6 = sshll.u32 %s848_s18, 3  ;;  %s610_s5 = sshll.u32 %s848_s18, 2 }
   0xe   : > { %643 = vmatpush3.bf16.msra.mxu0 %v689_v1  ;;  %v694_v6 = vld [vmem:[%s840_s1 + $0x60] sm:$0xff]   ;;  %v696_v8 = vld [vmem:[%s840_s1 + $0x58] sm:$0xff]   ;;  %s243_s11 = scalar_lea.vmem %s839_s0, %s634_s6  ;;  %v698_v10 = vld [vmem:[%s840_s1 + $0x50] sm:$0xff]   ;;  %s265_s8 = scalar_lea.vmem %s842_s3, %s610_s5 }
   0xf   : > { %644 = vmatprep.subr.bf16.mxu0 %v690_v2  ;;  %v695_v7 = vld [vmem:[%s840_s1 + $0x20] sm:$0xff]   ;;  %v697_v9 = vld [vmem:[%s840_s1 + $0x18] sm:$0xff]   ;;  %v699_v12 = vld [vmem:[%s840_s1 + $0x10] sm:$0xff]  }
  0x10   : > { %v706_v11 = vld [vmem:[%s243_s11 + $0x4] ss:$8 sps:$4 sm:$0xff]   ;;  %v704_v17 = vld [vmem:[%s243_s11] ss:$8 sps:$4 sm:$0xff]  }
  0x11   : > { %448 = vmatprep.mubr.bf16.mxu0 %v706_v11  ;;  %v700_v13 = vld [vmem:[%s840_s1 + $0x48] sm:$0xff]   ;;  %v702_v15 = vld [vmem:[%s840_s1 + $0x40] sm:$0xff]  }
  0x12   : > { %645 = vmatpush3.bf16.msra.mxu0 %v691_v3  ;;  %v701_v14 = vld [vmem:[%s840_s1 + $0x8] sm:$0xff]   ;;  %v703_v16 = vld [vmem:[%s840_s1] sm:$0xff]  }
  0x13   : > { %646 = vmatprep.subr.bf16.mxu0 %v692_v4  ;;  %v629_v22 = vld [vmem:[%s841_s2] ss:$0 sm:$0xff] }
  0x16   : > { %647 = vmatpush3.bf16.msra.mxu0 %v693_v5 }
  0x17   : > { %648 = vmatprep.subr.bf16.mxu0 %v694_v6 }
  0x1a   : > { %649 = vmatpush3.bf16.msra.mxu0 %v695_v7 }
  0x1b   : > { %650 = vmatprep.subr.bf16.mxu0 %v696_v8 }
  0x1e   : > { %651 = vmatpush3.bf16.msra.mxu0 %v697_v9 }
  0x1f   : > { %652 = vmatprep.subr.bf16.mxu0 %v698_v10 }
  0x22   : > { %653 = vmatpush3.bf16.msra.mxu0 %v699_v12 }
  0x23   : > { %654 = vmatprep.subr.bf16.mxu0 %v700_v13 }
  0x26   : > { %655 = vmatpush3.bf16.msra.mxu0 %v701_v14 }
  0x27   : > { %656 = vmatprep.subr.bf16.mxu0 %v702_v15 }
  0x2a   : > { %657 = vmatpush3.bf16.msra.mxu0 %v703_v16 }
  0x2d   : > { %449 = vmatmul.mubr.bf16.vlgmr.msra.gmra.mxu0 %v704_v17 }
  0xed   : > { %v658_v18 = vpop.f32.mrf.mxu0 }
  0xef   : > { %v659_v19 = vpop.f32.mrf.mxu0 }
  0xf0   : > { %v660_v21 = vadd.f32 %v659_v19, %v658_v18 }
  0xf1   : > { %v661_v20 = vpop.f32.mrf.mxu0 }
  0xf2   : > { %v473_v25 = vadd.f32 %v660_v21, %v629_v22 }
  0xf3   : > { %v662_v23 = vpop.f32.mrf.mxu0 }
  0xf4   : > { %v663_v24 = vadd.f32 %v662_v23, %v661_v20 }
  0xf6   : > { %v474_v26 = vadd.f32 %v663_v24, %v629_v22 }
  0xf8   : > { %v640_v27 = vpack.c.bf16 %v474_v26, %v473_v25 }
  0xfa   : > { %641 = vst [vmem:[%s265_s8] sm:$0xff] %v640_v27  }
  0xfb PF: > { %s13_s14 = sadd.s32 1, %s729_s14   ;;  %s843_s12 = smov %s725_s13 }
  0xfc   : > { %p10_p5 = scmp.ge.s32.totalorder %s13_s14, 4   ;;  %s844_s13 = smov %s846_s15 }
  0xfe   :  { %12 = sbr.rel (!%p10_p5) target bundleno = 2 (0x2), region = 76 }

// kernel: caue_bert_forward.19
= control target key start
LH: loop header
LB: loop body
LE: loop exit
PB: predicated region body
PF: predicated region fallthrough
CT: control target
= control target key end

     0   :  { %s780_s12 = smov 0   ;;  %s782_s13 = smov 0   ;;  %s868_s0 = inlined_call_operand.vmem [shape: bf16[32,128], index: 0, kind: input, shape index: {}]   ;;  %s869_s1 = inlined_call_operand.vmem [shape: bf16[128,256], index: 1, kind: input, shape index: {}]   ;;  %s870_s2 = inlined_call_operand.vmem [shape: f32[1,256], index: 2, kind: input, shape index: {}]   ;;  %s871_s3 = inlined_call_operand.vmem [shape: bf16[32,256], index: 3, kind: output, shape index: {}]  }
   0x1   :  { %s784_s14 = smov 0  }
   0x2 LB: > { %s32_s15 = sadd.s32 1, %s753_s13  ;;  %p647_p0 = scmp.ge.s32.totalorder %s757_s14, 1  ;;  %s757_s14 = sphi %s784_s14, %s13_s14   ;;  %s753_s13 = sphi %s782_s13, %s873_s13   ;;  %s749_s12 = sphi %s780_s12, %s872_s12  }
   0x3   : > { %p34_p1 = scmp.ge.s32.totalorder %s32_s15, 2  ;;  %p193_p2 = scmp.lt.s32.totalorder %s757_s14, 3 }
   0x5   : > { %s875_s15 = smov (%p34_p1, %s32_s15), 0  ;;  %p194_p3 = pnand %p647_p0, %p193_p2 }
   0x6   : > { %s648_s18 = sshll.u32 (!%p194_p3), %s749_s12, 1 }
   0x7   : > { %197 = sbr.rel (%p194_p3) target bundleno = 279 (0x117), region = 32  ;;  %p240_p4 = scmp.lt.s32.totalorder (!%p194_p3), %s648_s18, 3 }
   0xc   : > { %v702_v0 = vld [vmem:[%s869_s1 + $0x74] ss:$8 sps:$4 sm:$0xff]   ;;  %v704_v1 = vld [vmem:[%s869_s1 + $0x70] ss:$8 sps:$4 sm:$0xff]   ;;  %v759_v2 = vmov 0   ;;  %s877_s18 = smov (!%p240_p4, %s648_s18), 3  ;;  %v454_v18 = vlaneseq }
   0xd   : > { %426 = vmatprep.mubr.bf16.mxu0 %v759_v2  ;;  %394 = vmatprep.subr.bf16.mxu0 %v702_v0  ;;  %v705_v3 = vld [vmem:[%s869_s1 + $0x64] ss:$8 sps:$4 sm:$0xff]   ;;  %v707_v4 = vld [vmem:[%s869_s1 + $0x60] ss:$8 sps:$4 sm:$0xff]   ;;  %v708_v5 = vld [vmem:[%s869_s1 + $0x54] ss:$8 sps:$4 sm:$0xff]  }
   0xe   : > { %395 = vmatpush1.bf16.msra.mxu0 %v704_v1  ;;  %s649_s27 = sshll.u32 %s877_s18, 2  ;;  %v710_v6 = vld [vmem:[%s869_s1 + $0x50] ss:$8 sps:$4 sm:$0xff]   ;;  %v711_v7 = vld [vmem:[%s869_s1 + $0x44] ss:$8 sps:$4 sm:$0xff]   ;;  %v455_v19 = vshrl.u32 %v454_v18, 7 }
   0xf   : > { %396 = vmatprep.subr.bf16.mxu0 %v705_v3  ;;  %s246_s7 = scalar_lea.vmem %s868_s0, %s649_s27  ;;  %v713_v8 = vld [vmem:[%s869_s1 + $0x40] ss:$8 sps:$4 sm:$0xff]   ;;  %v714_v9 = vld [vmem:[%s869_s1 + $0x34] ss:$8 sps:$4 sm:$0xff]   ;;  %v716_v10 = vld [vmem:[%s869_s1 + $0x30] ss:$8 sps:$4 sm:$0xff]  }
  0x10   : > { %v717_v11 = vld [vmem:[%s869_s1 + $0x24] ss:$8 sps:$4 sm:$0xff]   ;;  %v719_v12 = vld [vmem:[%s869_s1 + $0x20] ss:$8 sps:$4 sm:$0xff]   ;;  %v720_v13 = vld [vmem:[%s869_s1 + $0x14] ss:$8 sps:$4 sm:$0xff]  }
  0x11   : > { %v722_v14 = vld [vmem:[%s869_s1 + $0x10] ss:$8 sps:$4 sm:$0xff]   ;;  %v723_v15 = vld [vmem:[%s869_s1 + $0x4] ss:$8 sps:$4 sm:$0xff]   ;;  %v725_v16 = vld [vmem:[%s869_s1] ss:$8 sps:$4 sm:$0xff]  }
  0x12   : > { %397 = vmatpush1.bf16.msra.mxu0 %v707_v4  ;;  %v726_v17 = vld [vmem:[%s246_s7] sm:$0xff]   ;;  %v456_v20 = vsub.s32 0, %v455_v19  ;;  %v460_v22 = vsub.s32 1, %v455_v19  ;;  %s674_s5 = sshll.u32 %s877_s18, 3 }
  0x13   : > { %398 = vmatprep.subr.bf16.mxu0 %v708_v5  ;;  %v452_v21 = vld [vmem:[%s870_s2] sm:$0x3]  ;;  %s274_s8 = scalar_lea.vmem %s871_s3, %s674_s5 }
  0x14   : > { %v457_v23 = vrot.slane %v452_v21, %v456_v20  ;;  %v461_v24 = vrot.slane %v452_v21, %v460_v22 }
  0x16   : > { %399 = vmatpush1.bf16.msra.mxu0 %v710_v6 }
  0x17   : > { %400 = vmatprep.subr.bf16.mxu0 %v711_v7 }
  0x1a   : > { %401 = vmatpush1.bf16.msra.mxu0 %v713_v8 }
  0x1b   : > { %402 = vmatprep.subr.bf16.mxu0 %v714_v9 }
  0x1e   : > { %403 = vmatpush1.bf16.msra.mxu0 %v716_v10 }
  0x1f   : > { %404 = vmatprep.subr.bf16.mxu0 %v717_v11 }
  0x22   : > { %405 = vmatpush1.bf16.msra.mxu0 %v719_v12 }
  0x23   : > { %406 = vmatprep.subr.bf16.mxu0 %v720_v13 }
  0x26   : > { %407 = vmatpush1.bf16.msra.mxu0 %v722_v14 }
  0x27   : > { %408 = vmatprep.subr.bf16.mxu0 %v723_v15 }
  0x2a   : > { %409 = vmatpush1.bf16.msra.mxu0 %v725_v16 }
  0x2d   : > { %427 = vmatmul.mubr.bf16.vlgmr.msra.gmra.mxu0 %v726_v17 }
  0xed   : > { %v428_v25 = vpop.f32.mrf.mxu0 }
  0xee   : > { %v464_v26 = vadd.f32 %v457_v23, %v428_v25 }
  0xef   : > { %v430_v27 = vpop.f32.mrf.mxu0 }
  0xf0   : > { %v468_v28 = vmul.f32 %v464_v26, %v464_v26  ;;  %v465_v29 = vadd.f32 %v461_v24, %v430_v27 }
  0xf1   : > { %v432_v30 = vpop.f32.mrf.mxu0 }
  0xf2   : > { %v472_v31 = vmul.f32 %v468_v28, %v464_v26  ;;  %v469_v32 = vmul.f32 %v465_v29, %v465_v29  ;;  %v466_v33 = vadd.f32 %v457_v23, %v432_v30 }
  0xf3   : > { %v434_v34 = vpop.f32.mrf.mxu0 }
  0xf4   : > { %v476_v35 = vmul.f32 0.044715, %v472_v31  ;;  %v473_v36 = vmul.f32 %v469_v32, %v465_v29  ;;  %v470_v37 = vmul.f32 %v466_v33, %v466_v33  ;;  %v467_v38 = vadd.f32 %v461_v24, %v434_v34 }
  0xf6   : > { %v480_v39 = vadd.f32 %v476_v35, %v464_v26  ;;  %v477_v40 = vmul.f32 0.044715, %v473_v36  ;;  %v474_v41 = vmul.f32 %v470_v37, %v466_v33  ;;  %v471_v42 = vmul.f32 %v467_v38, %v467_v38 }
  0xf8   : > { %v484_v43 = vmul.f32 0.7978846, %v480_v39  ;;  %v481_v44 = vadd.f32 %v477_v40, %v465_v29  ;;  %v478_v45 = vmul.f32 0.044715, %v474_v41  ;;  %v475_v46 = vmul.f32 %v471_v42, %v467_v38 }
  0xfa   : > { %727 = vtanh.f32 %v484_v43  ;;  %v485_v47 = vmul.f32 0.7978846, %v481_v44  ;;  %v482_v48 = vadd.f32 %v478_v45, %v466_v33  ;;  %v479_v49 = vmul.f32 0.044715, %v475_v46 }
  0xfc   : > { %729 = vtanh.f32 %v485_v47  ;;  %v486_v50 = vmul.f32 0.7978846, %v482_v48  ;;  %v483_v51 = vadd.f32 %v479_v49, %v467_v38 }
  0xfe   : > { %731 = vtanh.f32 %v486_v50  ;;  %v487_v52 = vmul.f32 0.7978846, %v483_v51 }
 0x100   : > { %733 = vtanh.f32 %v487_v52 }
 0x107   : > { %v728_v53 = vpop.eup %727 }
 0x108   : > { %v492_v54 = vadd.f32 1.0, %v728_v53 }
 0x109   : > { %v730_v55 = vpop.eup %729 }
 0x10a   : > { %v496_v56 = vmul.f32 0.5, %v492_v54  ;;  %v493_v57 = vadd.f32 1.0, %v730_v55 }
 0x10b   : > { %v732_v58 = vpop.eup %731 }
 0x10c   : > { %v497_v59 = vmul.f32 0.5, %v493_v57  ;;  %v494_v60 = vadd.f32 1.0, %v732_v58  ;;  %v500_v62 = vmul.f32 %v496_v56, %v464_v26 }
 0x10d   : > { %v734_v61 = vpop.eup %733 }
 0x10e   : > { %v501_v63 = vmul.f32 %v497_v59, %v465_v29  ;;  %v498_v0 = vmul.f32 0.5, %v494_v60  ;;  %v495_v1 = vadd.f32 1.0, %v734_v61 }
 0x110   : > { %v675_v2 = vpack.c.bf16 %v501_v63, %v500_v62  ;;  %v499_v3 = vmul.f32 0.5, %v495_v1  ;;  %v502_v4 = vmul.f32 %v498_v0, %v466_v33 }
 0x112   : > { %516 = vst [vmem:[%s274_s8] sm:$0xff] %v675_v2  ;;  %v503_v5 = vmul.f32 %v499_v3, %v467_v38 }
 0x114   : > { %v676_v6 = vpack.c.bf16 %v503_v5, %v502_v4 }
 0x116   : > { %517 = vst [vmem:[%s274_s8 + $0x8] sm:$0xff] %v676_v6 }
 0x117 PF: > { %s13_s14 = sadd.s32 1, %s757_s14   ;;  %s872_s12 = smov %s753_s13 }
 0x118   : > { %p10_p5 = scmp.ge.s32.totalorder %s13_s14, 4   ;;  %s873_s13 = smov %s875_s15 }
 0x11a   :  { %12 = sbr.rel (!%p10_p5) target bundleno = 2 (0x2), region = 76 }

// kernel: caue_bert_forward.28
= control target key start
LH: loop header
LB: loop body
LE: loop exit
PB: predicated region body
PF: predicated region fallthrough
CT: control target
= control target key end

     0   :  { %v197_v0 = vmov 0.0   ;;  %vm198_vm0 = vmmov 0   ;;  %s252_s1 = inlined_call_operand.vmem [shape: bf16[128,128], index: 1, kind: input, shape index: {}]   ;;  %s253_s0 = inlined_call_operand.vmem [shape: bf16[4,128], index: 0, kind: input, shape index: {}]   ;;  %s254_s2 = inlined_call_operand.vmem [shape: f32[1,128], index: 2, kind: input, shape index: {}]   ;;  %s255_s3 = inlined_call_operand.vmem [shape: bf16[4,128], index: 3, kind: output, shape index: {}]  }
   0x1   :  { %165 = vmatprep.subr.bf16.mxu0 %v197_v0  ;;  %19 = vst [vmem:[#allocation2] sm:$0xf] %v197_v0  ;;  %v187_v1 = vld [vmem:[%s252_s1 + $0x38] sm:$0xff]   ;;  %181 = vmatprep.mubr.msk.bf16.mxu0 %vm198_vm0, %v197_v0  ;;  %v188_v2 = vld [vmem:[%s252_s1 + $0x30] sm:$0xff]   ;;  %v189_v3 = vld [vmem:[%s252_s1 + $0x28] sm:$0xff]  }
   0x2   :  { %166 = vmatpush3.bf16.msra.mxu0 %v187_v1  ;;  %v190_v4 = vld [vmem:[%s252_s1 + $0x20] sm:$0xff]   ;;  %v191_v5 = vld [vmem:[%s252_s1 + $0x18] sm:$0xff]   ;;  %v192_v6 = vld [vmem:[%s252_s1 + $0x10] sm:$0xff]  }
   0x3   :  { %167 = vmatprep.subr.bf16.mxu0 %v197_v0  ;;  %v193_v7 = vld [vmem:[%s252_s1 + $0x8] sm:$0xff]   ;;  %v194_v8 = vld [vmem:[%s252_s1] sm:$0xff]  }
   0x4   :  { %v21_v9 = vld [vmem:[%s253_s0] sm:$0x3] }
   0x5   :  { %v155_v16 = vld [vmem:[%s254_s2] ss:$0 sm:$0xff] }
   0x6   :  { %168 = vmatpush3.bf16.msra.mxu0 %v188_v2 }
   0x7   :  { %169 = vmatprep.subr.bf16.mxu0 %v197_v0 }
   0x8   :  { %v20_v10 = vld [vmem:[#allocation2] sm:$0xf] }
   0xa   :  { %170 = vmatpush3.bf16.msra.mxu0 %v189_v3 }
   0xb   :  { %171 = vmatprep.subr.bf16.mxu0 %v197_v0 }
   0xe   :  { %172 = vmatpush3.bf16.msra.mxu0 %v190_v4 }
   0xf   :  { %173 = vmatprep.subr.bf16.mxu0 %v197_v0 }
  0x12   :  { %174 = vmatpush3.bf16.msra.mxu0 %v191_v5 }
  0x13   :  { %175 = vmatprep.subr.bf16.mxu0 %v197_v0 }
  0x16   :  { %176 = vmatpush3.bf16.msra.mxu0 %v192_v6 }
  0x17   :  { %177 = vmatprep.subr.bf16.mxu0 %v197_v0 }
  0x1a   :  { %178 = vmatpush3.bf16.msra.mxu0 %v193_v7 }
  0x1b   :  { %179 = vmatprep.subr.bf16.mxu0 %v197_v0 }
  0x1e   :  { %180 = vmatpush3.bf16.msra.mxu0 %v194_v8 }
  0x21   :  { %182 = vmatmul.mubr.bf16.vlgmr.msra.gmra.mxu0 %v21_v9 }
  0xe1   :  { %v120_v11 = vpop.f32.mrf.mxu0 }
  0xe2   :  { %v126_v12 = vadd.f32 %v120_v11, %v20_v10 }
  0xe3   :  { %v183_v13 = vpop.f32.mrf.mxu0 }
  0xe4   :  { %127 = vst [vmem:[#allocation2] sm:$0xf] %v126_v12 }
  0xe5   :  { %v123_v14 = vpop.f32.mrf.mxu0 }
  0xe7   :  { %v184_v15 = vpop.f32.mrf.mxu0 }
  0xeb   :  { %v131_v17 = vld [vmem:[#allocation2] sm:$0xf] }
  0xec   :  { %v139_v18 = vadd.f32 %v155_v16, %v131_v17 }
  0xee   :  { %195 = vtanh.f32 %v139_v18 }
  0xfb   :  { %v196_v19 = vpop.eup %195 }
  0xfc   :  { %v141_v20 = vpack.c.bf16 %v196_v19, %v196_v19 }
  0xfe   :  { %142 = vst [vmem:[%s255_s3] sm:$0x3] %v141_v20 }

// kernel: caue_bert_forward.29
= control target key start
LH: loop header
LB: loop body
LE: loop exit
PB: predicated region body
PF: predicated region fallthrough
CT: control target
= control target key end

     0   :  { %v205_v0 = vmov 0.0   ;;  %vm206_vm0 = vmmov 0   ;;  %v130_v19 = vlaneseq  ;;  %vm142_vm2 = vcmask 1043456   ;;  %s268_s1 = inlined_call_operand.vmem [shape: bf16[128,128], index: 1, kind: input, shape index: {}]   ;;  %s269_s0 = inlined_call_operand.vmem [shape: bf16[4,128], index: 0, kind: input, shape index: {}]   ;;  %s270_s2 = inlined_call_operand.vmem [shape: f32[1,128], index: 2, kind: input, shape index: {}]   ;;  %s271_s3 = inlined_call_operand.vmem [shape: f32[4,128], index: 3, kind: input, shape index: {}]   ;;  %s272_s4 = inlined_call_operand.vmem [shape: f32[4,1], index: 4, kind: output, shape index: {}]  }
   0x1   :  { %171 = vmatprep.subr.bf16.mxu0 %v205_v0  ;;  %v193_v1 = vld [vmem:[%s268_s1 + $0x38] sm:$0xff]   ;;  %187 = vmatprep.mubr.msk.bf16.mxu0 %vm206_vm0, %v205_v0  ;;  %v194_v2 = vld [vmem:[%s268_s1 + $0x30] sm:$0xff]   ;;  %v195_v3 = vld [vmem:[%s268_s1 + $0x28] sm:$0xff]   ;;  %vm146_vm3 = vcmask 3072  }
   0x2   :  { %172 = vmatpush3.bf16.msra.mxu0 %v193_v1  ;;  %v196_v4 = vld [vmem:[%s268_s1 + $0x20] sm:$0xff]   ;;  %v197_v5 = vld [vmem:[%s268_s1 + $0x18] sm:$0xff]   ;;  %v198_v6 = vld [vmem:[%s268_s1 + $0x10] sm:$0xff]   ;;  %v131_v20 = vshrl.u32 %v130_v19, 7 }
   0x3   :  { %173 = vmatprep.subr.bf16.mxu0 %v205_v0  ;;  %v199_v7 = vld [vmem:[%s268_s1 + $0x8] sm:$0xff]   ;;  %v200_v8 = vld [vmem:[%s268_s1] sm:$0xff]  }
   0x4   :  { %v18_v9 = vld [vmem:[%s269_s0] sm:$0x3]  ;;  %vm132_vm1 = vcmp.ge.s32.totalorder %v131_v20, 2 }
   0x5   :  { %v152_v10 = vld [vmem:[%s270_s2] ss:$0 sm:$0xff] }
   0x6   :  { %174 = vmatpush3.bf16.msra.mxu0 %v194_v2  ;;  %v140_v21 = vld [vmem:[%s271_s3] sm:$0xf] }
   0x7   :  { %175 = vmatprep.subr.bf16.mxu0 %v205_v0 }
   0xa   :  { %176 = vmatpush3.bf16.msra.mxu0 %v195_v3 }
   0xb   :  { %177 = vmatprep.subr.bf16.mxu0 %v205_v0 }
   0xe   :  { %178 = vmatpush3.bf16.msra.mxu0 %v196_v4 }
   0xf   :  { %179 = vmatprep.subr.bf16.mxu0 %v205_v0 }
  0x12   :  { %180 = vmatpush3.bf16.msra.mxu0 %v197_v5 }
  0x13   :  { %181 = vmatprep.subr.bf16.mxu0 %v205_v0 }
  0x16   :  { %182 = vmatpush3.bf16.msra.mxu0 %v198_v6 }
  0x17   :  { %183 = vmatprep.subr.bf16.mxu0 %v205_v0 }
  0x1a   :  { %184 = vmatpush3.bf16.msra.mxu0 %v199_v7 }
  0x1b   :  { %185 = vmatprep.subr.bf16.mxu0 %v205_v0 }
  0x1e   :  { %186 = vmatpush3.bf16.msra.mxu0 %v200_v8 }
  0x21   :  { %188 = vmatmul.mubr.bf16.vlgmr.msra.gmra.mxu0 %v18_v9 }
  0xe1   :  { %v124_v11 = vpop.f32.mrf.mxu0 }
  0xe2   :  { %v125_v12 = vadd.f32 %v152_v10, %v124_v11 }
  0xe3   :  { %v189_v13 = vpop.f32.mrf.mxu0 }
  0xe4   :  { %v161_v14 = vmul.f32 -1.442695, %v125_v12 }
  0xe5   :  { %v127_v15 = vpop.f32.mrf.mxu0 }
  0xe6   :  { %201 = vpow2.f32 %v161_v14 }
  0xe7   :  { %v190_v16 = vpop.f32.mrf.mxu0 }
  0xf3   :  { %v202_v17 = vpop.eup %201 }
  0xf4   :  { %v136_v18 = vadd.f32 1.0, %v202_v17 }
  0xf6   :  { %203 = vrcp.f32 %v136_v18 }
 0x103   :  { %v204_v22 = vpop.eup %203 }
 0x104   :  { %v139_v23 = vsel %vm132_vm1, %v204_v22, %v125_v12 }
 0x105   :  { %v141_v24 = vmul.f32 %v140_v21, %v139_v23 }
 0x107   :  { %v143_v25 = vsel %vm142_vm2, %v141_v24, 0.0 }
 0x108   :  { %144 = vadd.xlane.f32.xlu0 %v143_v25 }
 0x191   :  { %v145_v26 = vpop.xlane.xlu0 %144 }
 0x192   :  { %147 = vst.msk [vmem:[%s272_s4] sm:$0xf] %vm146_vm3, %v145_v26 }

</bundles_post_ra>
